<compile_context>
chip_gen: v5e
topology: v5e:2x2
jax: 0.10.0
libtpu: 0.0.40
codegen_flags: <defaults>
</compile_context>

<pallas_src>
import numpy as np
import jax
import jax.numpy as jnp
from jax.experimental import pallas as pl
from jax.experimental.pallas import tpu as pltpu

# ----------------------------- model dimensions -----------------------------
N = 2                      # batch
H = W = 16                 # input spatial
C1 = 32                    # encoder channels
K = 5                      # conv kernel size
PAD = 2                    # conv padding
Hp, Wp = H // 2, W // 2    # after MaxPool2d(2): 8, 8
Hout, Wout = 2 * Hp, 2 * Wp  # after UpsamplingBilinear2d(2): 16, 16
EPS = 1e-5
NHW = N * H * W            # 512 positions per channel for BN batch stats

KPAD = 32                  # per-wo patch lanes padded 25 -> 32 (dense MXU tiles)
ENC_ROWS = N * Hp          # 16  pooled slab rows  (n, ho)
ENC_LANES = Wp * C1        # 256 pooled slab lanes (wo, c)  -> lane-dense
PATCH_ROWS = 4 * ENC_ROWS  # 64  patch rows (py, px, n, ho)
PATCH_LANES = Wp * KPAD    # 256 patch lanes (wo, kpad)
DEC_ROWS = N * Hout        # 32  decoded rows (n, i)
MSTACK_ROWS = K * DEC_ROWS  # 160 rows of the stacked Mshift factor


# ------------------------------ fused Pallas kernel --------------------------
def autoenc_kernel(p_ref, w1_ref, bnc_ref, dconst_ref, enc_ref, dec_ref):
    """Whole CNN_Autoencoder forward in one grid-less kernel invocation.

    p_ref      : (64, 256)   im2col patches, rows (py,px,n,ho), lanes (wo, kpad)
    w1_ref     : (256, 256)  block-diagonal conv1 weight (kpad rows 25..31 zero)
    bnc_ref    : (3, 256)    row0 BN gamma (tiled over wo), row1 BN beta, row2 conv2 bias
    dconst_ref : (1440, 16)  rows 0..159 = mstack (Mshift[dy] stacked),
                             rows 160..1439 = cstack (C[dy] stacked)
    enc_ref    : (16, 256)   pooled encoder activations (lane-dense)
    dec_ref    : (32, 16)    decoded image rows (n, i) x lanes j
    """
    # ---- encoder: conv1 as one dense matmul (conv1 bias dropped: batch-stat BN cancels it)
    y = jnp.dot(p_ref[...], w1_ref[...], preferred_element_type=jnp.float32)  # (64, 256)

    # ---- BatchNorm2d (training-mode batch stats), single pass.  The per-channel
    #      reduction over the 8 wo lane-groups is a circular lane roll-tree:
    #      lane l ends with sum over {l - 32k mod 256} = per-channel sum, already
    #      broadcast back across all wo groups (replaces the old gavg matmuls).
    s1 = jnp.sum(y, axis=0, keepdims=True)          # (1, 256) per-(wo,c) sums
    s2 = jnp.sum(y * y, axis=0, keepdims=True)      # (1, 256) per-(wo,c) sum of squares

    def lane_group_sum(v):
        v = v + pltpu.roll(v, 32, 1)
        v = v + pltpu.roll(v, 64, 1)
        v = v + pltpu.roll(v, 128, 1)
        return v

    inv_nhw = 1.0 / float(NHW)
    mean = lane_group_sum(s1) * inv_nhw
    ey2 = lane_group_sum(s2) * inv_nhw
    var = jnp.maximum(ey2 - mean * mean, 0.0)       # clamp: single-pass var can cancel < 0

    bnc = bnc_ref[...]                              # (3, 256)
    scale = bnc[0:1, :] * jax.lax.rsqrt(var + EPS)
    shift = bnc[1:2, :] - mean * scale
    ya = jnp.maximum(y * scale + shift, 0.0)        # BN affine + ReLU in one pass

    # ---- MaxPool2d(2): max over the 4 pool-window row chunks ----
    enc = jnp.maximum(
        jnp.maximum(ya[0:ENC_ROWS], ya[ENC_ROWS:2 * ENC_ROWS]),
        jnp.maximum(ya[2 * ENC_ROWS:3 * ENC_ROWS], ya[3 * ENC_ROWS:4 * ENC_ROWS]))
    enc_ref[...] = enc                              # lane-dense (16, 256) store

    # ---- decoder: conv2 + bilinear upsample = b2 + sum_dy (Mshift[dy] @ enc) @ C[dy]
    #      re-associated: one (160,16)@(16,256) then five K=256 matmuls (6 MXU ops).
    u = jnp.dot(dconst_ref[0:MSTACK_ROWS, :], enc,
                preferred_element_type=jnp.float32)                 # (160, 256)
    acc = jnp.dot(u[0:DEC_ROWS, :],
                  dconst_ref[MSTACK_ROWS:MSTACK_ROWS + ENC_LANES, :],
                  preferred_element_type=jnp.float32)               # (32, 16)
    for dy in range(1, K):                                          # unrolled, static aligned slices
        u_dy = u[dy * DEC_ROWS:(dy + 1) * DEC_ROWS, :]              # (32, 256)
        c_dy = dconst_ref[MSTACK_ROWS + dy * ENC_LANES:
                          MSTACK_ROWS + (dy + 1) * ENC_LANES, :]    # (256, 16)
        acc = acc + jnp.dot(u_dy, c_dy, preferred_element_type=jnp.float32)
    # conv2 bias reduces to a scalar add because bilinear rows sum to 1.
    dec_ref[...] = acc + bnc[2:3, 0:Wout]


# ------------------------------ pallas wrapper --------------------------------
def autoenc_pallas(patches, w1blk, bnc, dconst):
    # Single invocation (no grid): whole-array VMEM operands, no pipelining
    # scaffolding or double-buffering for one-shot inputs.
    return pl.pallas_call(
        autoenc_kernel,
        out_shape=(jax.ShapeDtypeStruct((ENC_ROWS, ENC_LANES), jnp.float32),
                   jax.ShapeDtypeStruct((DEC_ROWS, Wout), jnp.float32)),
        cost_estimate=pl.CostEstimate(flops=11_200_000, transcendentals=256,
                                      bytes_accessed=441_344),
    )(patches, w1blk, bnc, dconst)


# ------------------------------ jitted forward glue ---------------------------
def _build_patches(x):
    """x (N,1,H,W) -> (64, 256) im2col slab; rows (py,px,n,ho), lanes (wo, kpad).

    One conv_general_dilated_patches op + one pad/reshape/transpose fusion
    (replaces the old 25-slice stack + strided 4-block concat prologue).
    """
    p = jax.lax.conv_general_dilated_patches(
        x, (K, K), (1, 1), ((PAD, PAD), (PAD, PAD)),
        dimension_numbers=('NCHW', 'OIHW', 'NCHW'),
        precision=jax.lax.Precision.HIGHEST)                  # (N, 25, H, W), k = dy*K+dx
    p = jnp.pad(p, ((0, 0), (0, KPAD - K * K), (0, 0), (0, 0)))   # k padded 25 -> 32
    p = p.reshape(N, KPAD, Hp, 2, Wp, 2)                      # (n, k, ho, py, wo, px)
    p = p.transpose(3, 5, 0, 2, 4, 1)                         # (py, px, n, ho, wo, k)
    return p.reshape(PATCH_ROWS, PATCH_LANES)                 # (64, 256)


@jax.jit
def cnn_autoencoder_forward(x, w1blk, bnc, dconst):
    patches = _build_patches(x)
    enc, dec = autoenc_pallas(patches, w1blk, bnc, dconst)
    encoded = enc.reshape(N, Hp, Wp, C1).transpose(0, 3, 1, 2)    # NCHW
    decoded = dec.reshape(N, 1, Hout, Wout)
    return encoded, decoded


# --------------------------- host-side parameter setup ------------------------
def bilinear_matrix(n_in, n_out):
    """align_corners=True bilinear interpolation matrix (n_out, n_in); rows sum to 1."""
    m = np.zeros((n_out, n_in), np.float32)
    if n_in == 1:
        m[:, 0] = 1.0
        return m
    scale = (n_in - 1) / (n_out - 1)
    for i in range(n_out):
        src = i * scale
        i0 = int(np.floor(src))
        i1 = min(i0 + 1, n_in - 1)
        f = src - i0
        m[i, i0] += 1.0 - f
        m[i, i1] += f
    return m


def build_w1blk(w1_np):
    """W1 (C1,1,K,K) -> block-diagonal (Wp*KPAD, Wp*C1) conv1 matmul weight (k rows padded)."""
    w1flat = w1_np[:, 0].transpose(1, 2, 0).reshape(K * K, C1)   # rows k = (dy, dx)
    blk = np.zeros((PATCH_LANES, ENC_LANES), np.float32)
    for wo in range(Wp):
        blk[wo * KPAD:wo * KPAD + K * K, wo * C1:(wo + 1) * C1] = w1flat
    return jnp.asarray(blk)


def build_cstack(w2_np, mw_np):
    """C[dy][(wo,c), j] = sum_w Mw[j,w] * W2[0,c,dy,wo-w+PAD]; stacked over dy -> (1280,16)."""
    T = np.zeros((K, Wp, Wp, C1), np.float32)          # [dy, wo, w, c]
    for dy in range(K):
        for q in range(Wp):
            for w in range(Wp):
                dx = q - w + PAD
                if 0 <= dx < K:
                    T[dy, q, w, :] = w2_np[0, :, dy, dx]
    C = np.einsum('dqwc,jw->dqcj', T, mw_np)           # (K, Wp, C1, Wout)
    return C.reshape(K * Wp * C1, Wout).astype(np.float32)


def build_mstack(mh_np):
    """Mshift[dy][(n,i),(n,p)] = Mh[i, p-dy+PAD] (valid); stacked over dy -> (160,16)."""
    M = np.zeros((K, N * Hout, N * Hp), np.float32)
    for dy in range(K):
        for n in range(N):
            for i in range(Hout):
                for p in range(Hp):
                    h = p - dy + PAD
                    if 0 <= h < Hp:
                        M[dy, n * Hout + i, n * Hp + p] = mh_np[i, h]
    return M.reshape(K * N * Hout, N * Hp).astype(np.float32)


# ------------------------------ pure-JAX reference ----------------------------
def reference_forward(x, w1, b1, gamma, beta, w2, b2, mmat):
    hp = jax.lax.Precision.HIGHEST
    y = jax.lax.conv_general_dilated(
        x, w1, (1, 1), ((PAD, PAD), (PAD, PAD)),
        dimension_numbers=('NCHW', 'OIHW', 'NCHW'), precision=hp)
    y = y + b1[None, :, None, None]
    mean = jnp.mean(y, axis=(0, 2, 3), keepdims=True)
    var = jnp.mean(jnp.square(y - mean), axis=(0, 2, 3), keepdims=True)
    y = (y - mean) / jnp.sqrt(var + EPS)
    y = y * gamma[None, :, None, None] + beta[None, :, None, None]
    y = jnp.maximum(y, 0.0)
    encoded = jnp.max(y.reshape(N, C1, Hp, 2, Wp, 2), axis=(3, 5))
    z = jax.lax.conv_general_dilated(
        encoded, w2, (1, 1), ((PAD, PAD), (PAD, PAD)),
        dimension_numbers=('NCHW', 'OIHW', 'NCHW'), precision=hp)
    z = z + b2[None, :, None, None]
    decoded = jnp.einsum('ih,nchw,jw->ncij', mmat, z, mmat, precision=hp)
    return encoded, decoded


# ------------------------------------ main ------------------------------------
if __name__ == "__main__":
    key = jax.random.PRNGKey(0)
    k1, k2, k3, k4, k5, k6, kx = jax.random.split(key, 7)
    # deterministic synthetic parameters (shapes from the PyTorch module __init__)
    W1 = 0.1 * jax.random.normal(k1, (C1, 1, K, K), jnp.float32)   # conv1 weight
    B1 = 0.1 * jax.random.normal(k2, (C1,), jnp.float32)           # conv1 bias (cancels in BN)
    GAMMA = 1.0 + 0.1 * jax.random.normal(k3, (C1,), jnp.float32)  # BN weight
    BETA = 0.1 * jax.random.normal(k4, (C1,), jnp.float32)         # BN bias
    W2 = 0.1 * jax.random.normal(k5, (1, C1, K, K), jnp.float32)   # conv2 weight
    B2 = 0.1 * jax.random.normal(k6, (1,), jnp.float32)            # conv2 bias
    x = jax.random.normal(kx, (N, 1, H, W), jnp.float32)

    # derived operands (parameter-setup glue, built once on the host)
    Mmat_np = bilinear_matrix(Hp, Hout)                            # (16, 8), Mh == Mw
    W1BLK = build_w1blk(np.asarray(W1))                            # (256, 256)
    MSTACK = build_mstack(Mmat_np)                                 # (160, 16)
    CSTACK = build_cstack(np.asarray(W2), Mmat_np)                 # (1280, 16)
    DCONST = jnp.asarray(np.concatenate([MSTACK, CSTACK], axis=0))  # (1440, 16) one DMA
    bnc_np = np.zeros((3, ENC_LANES), np.float32)                  # (3, 256) one DMA
    bnc_np[0] = np.tile(np.asarray(GAMMA), Wp)                     # gamma, lanes (wo, c)
    bnc_np[1] = np.tile(np.asarray(BETA), Wp)                      # beta,  lanes (wo, c)
    bnc_np[2] = float(np.asarray(B2)[0])                           # conv2 bias (scalar)
    BNC = jnp.asarray(bnc_np)
    MMAT = jnp.asarray(Mmat_np)

    encoded, decoded = cnn_autoencoder_forward(x, W1BLK, BNC, DCONST)
    jax.block_until_ready(encoded)
    jax.block_until_ready(decoded)

    assert encoded.shape == (N, C1, Hp, Wp)
    assert decoded.shape == (N, 1, Hout, Wout)

    enc_ref, dec_ref = reference_forward(x, W1, B1, GAMMA, BETA, W2, B2, MMAT)
    # all-f32 path: tolerance tightened 10x vs rev 2 (still leaves hw-rounding margin)
    np.testing.assert_allclose(np.asarray(encoded), np.asarray(enc_ref),
                               rtol=1e-3, atol=1e-3)
    np.testing.assert_allclose(np.asarray(decoded), np.asarray(dec_ref),
                               rtol=1e-3, atol=1e-3)

    print("KERNEL_OK")
</pallas_src>

<mosaic_0001>
module attributes {stable_mosaic.version = 11 : i64} {
  func.func @autoenc_kernel(%arg0: memref<64x256xf32, #tpu.memory_space<vmem>>, %arg1: memref<256x256xf32, #tpu.memory_space<vmem>>, %arg2: memref<3x256xf32, #tpu.memory_space<vmem>>, %arg3: memref<1440x16xf32, #tpu.memory_space<vmem>>, %arg4: memref<16x256xf32, #tpu.memory_space<vmem>>, %arg5: memref<32x16xf32, #tpu.memory_space<vmem>>) attributes {dimension_semantics = [], scalar_prefetch = 0 : i64, scratch_operands = 0 : i64, tpu.core_type = #tpu.core_type<tc>} {
    %c0 = arith.constant 0 : index
    %c0_0 = arith.constant 0 : index
    %0 = vector.load %arg0[%c0, %c0_0] : memref<64x256xf32, #tpu.memory_space<vmem>>, vector<64x256xf32>
    %c0_1 = arith.constant 0 : index
    %c0_2 = arith.constant 0 : index
    %1 = vector.load %arg1[%c0_1, %c0_2] : memref<256x256xf32, #tpu.memory_space<vmem>>, vector<256x256xf32>
    %cst = arith.constant dense<0.000000e+00> : vector<64x256xf32>
    %2 = tpu.matmul %0, %1, %cst {dimension_numbers = #tpu.dot_dimension_numbers<[1], [0], [0], [1], [0, 0, 1, 1], [], []>} : vector<64x256xf32>, vector<256x256xf32>, vector<64x256xf32> -> vector<64x256xf32>
    %cst_3 = arith.constant dense<0.000000e+00> : vector<256xf32>
    %3 = vector.multi_reduction <add>, %2, %cst_3 [0] : vector<64x256xf32> to vector<256xf32>
    %4 = vector.shape_cast %3 : vector<256xf32> to vector<1x256xf32>
    %5 = arith.mulf %2, %2 : vector<64x256xf32>
    %cst_4 = arith.constant dense<0.000000e+00> : vector<256xf32>
    %6 = vector.multi_reduction <add>, %5, %cst_4 [0] : vector<64x256xf32> to vector<256xf32>
    %7 = vector.shape_cast %6 : vector<256xf32> to vector<1x256xf32>
    %c32_i32 = arith.constant 32 : i32
    %8 = tpu.dynamic_rotate %4 by %c32_i32 dim 1 : vector<1x256xf32>, i32 -> vector<1x256xf32>
    %9 = arith.addf %4, %8 : vector<1x256xf32>
    %c64_i32 = arith.constant 64 : i32
    %10 = tpu.dynamic_rotate %9 by %c64_i32 dim 1 : vector<1x256xf32>, i32 -> vector<1x256xf32>
    %11 = arith.addf %9, %10 : vector<1x256xf32>
    %c128_i32 = arith.constant 128 : i32
    %12 = tpu.dynamic_rotate %11 by %c128_i32 dim 1 : vector<1x256xf32>, i32 -> vector<1x256xf32>
    %13 = arith.addf %11, %12 : vector<1x256xf32>
    %cst_5 = arith.constant 0.001953125 : f32
    %14 = vector.broadcast %cst_5 : f32 to vector<1x256xf32>
    %15 = arith.mulf %13, %14 : vector<1x256xf32>
    %c32_i32_6 = arith.constant 32 : i32
    %16 = tpu.dynamic_rotate %7 by %c32_i32_6 dim 1 : vector<1x256xf32>, i32 -> vector<1x256xf32>
    %17 = arith.addf %7, %16 : vector<1x256xf32>
    %c64_i32_7 = arith.constant 64 : i32
    %18 = tpu.dynamic_rotate %17 by %c64_i32_7 dim 1 : vector<1x256xf32>, i32 -> vector<1x256xf32>
    %19 = arith.addf %17, %18 : vector<1x256xf32>
    %c128_i32_8 = arith.constant 128 : i32
    %20 = tpu.dynamic_rotate %19 by %c128_i32_8 dim 1 : vector<1x256xf32>, i32 -> vector<1x256xf32>
    %21 = arith.addf %19, %20 : vector<1x256xf32>
    %cst_9 = arith.constant 0.001953125 : f32
    %22 = vector.broadcast %cst_9 : f32 to vector<1x256xf32>
    %23 = arith.mulf %21, %22 : vector<1x256xf32>
    %24 = arith.mulf %15, %15 : vector<1x256xf32>
    %25 = arith.subf %23, %24 : vector<1x256xf32>
    %cst_10 = arith.constant 0.000000e+00 : f32
    %26 = vector.broadcast %cst_10 : f32 to vector<1x256xf32>
    %27 = arith.maximumf %25, %26 : vector<1x256xf32>
    %c0_11 = arith.constant 0 : index
    %c0_12 = arith.constant 0 : index
    %28 = vector.load %arg2[%c0_11, %c0_12] : memref<3x256xf32, #tpu.memory_space<vmem>>, vector<3x256xf32>
    %29 = vector.extract_strided_slice %28 {offsets = [0, 0], sizes = [1, 256], strides = [1, 1]} : vector<3x256xf32> to vector<1x256xf32>
    %cst_13 = arith.constant 9.99999974E-6 : f32
    %30 = vector.broadcast %cst_13 : f32 to vector<1x256xf32>
    %31 = arith.addf %27, %30 : vector<1x256xf32>
    %32 = math.rsqrt %31 : vector<1x256xf32>
    %33 = arith.mulf %29, %32 : vector<1x256xf32>
    %34 = vector.extract_strided_slice %28 {offsets = [1, 0], sizes = [1, 256], strides = [1, 1]} : vector<3x256xf32> to vector<1x256xf32>
    %35 = arith.mulf %15, %33 : vector<1x256xf32>
    %36 = arith.subf %34, %35 : vector<1x256xf32>
    %37 = vector.broadcast %33 : vector<1x256xf32> to vector<64x256xf32>
    %38 = arith.mulf %2, %37 : vector<64x256xf32>
    %39 = vector.broadcast %36 : vector<1x256xf32> to vector<64x256xf32>
    %40 = arith.addf %38, %39 : vector<64x256xf32>
    %cst_14 = arith.constant 0.000000e+00 : f32
    %41 = vector.broadcast %cst_14 : f32 to vector<64x256xf32>
    %42 = arith.maximumf %40, %41 : vector<64x256xf32>
    %43 = vector.extract_strided_slice %42 {offsets = [0, 0], sizes = [16, 256], strides = [1, 1]} : vector<64x256xf32> to vector<16x256xf32>
    %44 = vector.extract_strided_slice %42 {offsets = [16, 0], sizes = [16, 256], strides = [1, 1]} : vector<64x256xf32> to vector<16x256xf32>
    %45 = arith.maximumf %43, %44 : vector<16x256xf32>
    %46 = vector.extract_strided_slice %42 {offsets = [32, 0], sizes = [16, 256], strides = [1, 1]} : vector<64x256xf32> to vector<16x256xf32>
    %47 = vector.extract_strided_slice %42 {offsets = [48, 0], sizes = [16, 256], strides = [1, 1]} : vector<64x256xf32> to vector<16x256xf32>
    %48 = arith.maximumf %46, %47 : vector<16x256xf32>
    %49 = arith.maximumf %45, %48 : vector<16x256xf32>
    %c0_15 = arith.constant 0 : index
    %c0_16 = arith.constant 0 : index
    %50 = vector.load %arg4[%c0_15, %c0_16] : memref<16x256xf32, #tpu.memory_space<vmem>>, vector<16x256xf32>
    tpu.vector_store %arg4[%c0_15, %c0_16], %49 {strides = array<i32>} : memref<16x256xf32, #tpu.memory_space<vmem>>, vector<16x256xf32>,
    %c0_17 = arith.constant 0 : index
    %c0_18 = arith.constant 0 : index
    %51 = vector.load %arg3[%c0_17, %c0_18] : memref<1440x16xf32, #tpu.memory_space<vmem>>, vector<160x16xf32>
    %cst_19 = arith.constant dense<0.000000e+00> : vector<160x256xf32>
    %52 = tpu.matmul %51, %49, %cst_19 {dimension_numbers = #tpu.dot_dimension_numbers<[1], [0], [0], [1], [0, 0, 1, 1], [], []>} : vector<160x16xf32>, vector<16x256xf32>, vector<160x256xf32> -> vector<160x256xf32>
    %53 = vector.extract_strided_slice %52 {offsets = [0, 0], sizes = [32, 256], strides = [1, 1]} : vector<160x256xf32> to vector<32x256xf32>
    %c160 = arith.constant 160 : index
    %c0_20 = arith.constant 0 : index
    %54 = vector.load %arg3[%c160, %c0_20] : memref<1440x16xf32, #tpu.memory_space<vmem>>, vector<256x16xf32>
    %cst_21 = arith.constant dense<0.000000e+00> : vector<32x16xf32>
    %55 = tpu.matmul %53, %54, %cst_21 {dimension_numbers = #tpu.dot_dimension_numbers<[1], [0], [0], [1], [0, 0, 1, 1], [], []>} : vector<32x256xf32>, vector<256x16xf32>, vector<32x16xf32> -> vector<32x16xf32>
    %56 = vector.extract_strided_slice %52 {offsets = [32, 0], sizes = [32, 256], strides = [1, 1]} : vector<160x256xf32> to vector<32x256xf32>
    %c416 = arith.constant 416 : index
    %c0_22 = arith.constant 0 : index
    %57 = vector.load %arg3[%c416, %c0_22] : memref<1440x16xf32, #tpu.memory_space<vmem>>, vector<256x16xf32>
    %cst_23 = arith.constant dense<0.000000e+00> : vector<32x16xf32>
    %58 = tpu.matmul %56, %57, %cst_23 {dimension_numbers = #tpu.dot_dimension_numbers<[1], [0], [0], [1], [0, 0, 1, 1], [], []>} : vector<32x256xf32>, vector<256x16xf32>, vector<32x16xf32> -> vector<32x16xf32>
    %59 = arith.addf %55, %58 : vector<32x16xf32>
    %60 = vector.extract_strided_slice %52 {offsets = [64, 0], sizes = [32, 256], strides = [1, 1]} : vector<160x256xf32> to vector<32x256xf32>
    %c672 = arith.constant 672 : index
    %c0_24 = arith.constant 0 : index
    %61 = vector.load %arg3[%c672, %c0_24] : memref<1440x16xf32, #tpu.memory_space<vmem>>, vector<256x16xf32>
    %cst_25 = arith.constant dense<0.000000e+00> : vector<32x16xf32>
    %62 = tpu.matmul %60, %61, %cst_25 {dimension_numbers = #tpu.dot_dimension_numbers<[1], [0], [0], [1], [0, 0, 1, 1], [], []>} : vector<32x256xf32>, vector<256x16xf32>, vector<32x16xf32> -> vector<32x16xf32>
    %63 = arith.addf %59, %62 : vector<32x16xf32>
    %64 = vector.extract_strided_slice %52 {offsets = [96, 0], sizes = [32, 256], strides = [1, 1]} : vector<160x256xf32> to vector<32x256xf32>
    %c928 = arith.constant 928 : index
    %c0_26 = arith.constant 0 : index
    %65 = vector.load %arg3[%c928, %c0_26] : memref<1440x16xf32, #tpu.memory_space<vmem>>, vector<256x16xf32>
    %cst_27 = arith.constant dense<0.000000e+00> : vector<32x16xf32>
    %66 = tpu.matmul %64, %65, %cst_27 {dimension_numbers = #tpu.dot_dimension_numbers<[1], [0], [0], [1], [0, 0, 1, 1], [], []>} : vector<32x256xf32>, vector<256x16xf32>, vector<32x16xf32> -> vector<32x16xf32>
    %67 = arith.addf %63, %66 : vector<32x16xf32>
    %68 = vector.extract_strided_slice %52 {offsets = [128, 0], sizes = [32, 256], strides = [1, 1]} : vector<160x256xf32> to vector<32x256xf32>
    %c1184 = arith.constant 1184 : index
    %c0_28 = arith.constant 0 : index
    %69 = vector.load %arg3[%c1184, %c0_28] : memref<1440x16xf32, #tpu.memory_space<vmem>>, vector<256x16xf32>
    %cst_29 = arith.constant dense<0.000000e+00> : vector<32x16xf32>
    %70 = tpu.matmul %68, %69, %cst_29 {dimension_numbers = #tpu.dot_dimension_numbers<[1], [0], [0], [1], [0, 0, 1, 1], [], []>} : vector<32x256xf32>, vector<256x16xf32>, vector<32x16xf32> -> vector<32x16xf32>
    %71 = arith.addf %67, %70 : vector<32x16xf32>
    %72 = vector.extract_strided_slice %28 {offsets = [2, 0], sizes = [1, 16], strides = [1, 1]} : vector<3x256xf32> to vector<1x16xf32>
    %73 = vector.broadcast %72 : vector<1x16xf32> to vector<32x16xf32>
    %74 = arith.addf %71, %73 : vector<32x16xf32>
    %c0_30 = arith.constant 0 : index
    %c0_31 = arith.constant 0 : index
    %75 = vector.load %arg5[%c0_30, %c0_31] : memref<32x16xf32, #tpu.memory_space<vmem>>, vector<32x16xf32>
    tpu.vector_store %arg5[%c0_30, %c0_31], %74 {strides = array<i32>} : memref<32x16xf32, #tpu.memory_space<vmem>>, vector<32x16xf32>,
    return
  }
}

</mosaic_0001>

<bundles_post_ra>
// kernel: cnn_autoencoder_forward.1
= control target key start
LH: loop header
LB: loop body
LE: loop exit
PB: predicated region body
PF: predicated region fallthrough
CT: control target
= control target key end

     0   :  { %s2282_s0 = inlined_call_operand.vmem [shape: f32[64,256], index: 0, kind: input, shape index: {}]   ;;  %s2283_s1 = inlined_call_operand.vmem [shape: f32[256,256], index: 1, kind: input, shape index: {}]   ;;  %s2284_s2 = inlined_call_operand.vmem [shape: f32[3,256], index: 2, kind: input, shape index: {}]   ;;  %s2285_s3 = inlined_call_operand.vmem [shape: f32[1440,16], index: 3, kind: input, shape index: {}]   ;;  %s2286_s4 = inlined_call_operand.vmem [shape: f32[16,256], index: 4, kind: output, shape index: {0}]   ;;  %s2287_s5 = inlined_call_operand.hbm [shape: f32[32,16], index: 5, kind: output, shape index: {1}]  }
   0x1   :  { %v66_v0 = vld [vmem:[%s2283_s1 + $0xf0] sm:$0xff]  ;;  %v67_v2 = vld [vmem:[%s2283_s1 + $0xf8] sm:$0xff]  ;;  %v64_v4 = vld [vmem:[%s2283_s1 + $0xe0] sm:$0xff] }
   0x2   :  { %v98_v1 = vld [vmem:[%s2283_s1 + $0x1f0] sm:$0xff]  ;;  %100 = vmatpush.msra.mxu0 %v66_v0  ;;  %v99_v3 = vld [vmem:[%s2283_s1 + $0x1f8] sm:$0xff]  ;;  %v96_v5 = vld [vmem:[%s2283_s1 + $0x1e0] sm:$0xff]  ;;  %182 = vmatpush.msra.mxu2 %v67_v2 }
   0x3   :  { %141 = vmatpush.msra.mxu1 %v98_v1  ;;  %223 = vmatpush.msra.mxu3 %v99_v3  ;;  %v65_v6 = vld [vmem:[%s2283_s1 + $0xe8] sm:$0xff]  ;;  %v62_v8 = vld [vmem:[%s2283_s1 + $0xd0] sm:$0xff]  ;;  %v63_v10 = vld [vmem:[%s2283_s1 + $0xd8] sm:$0xff] }
   0x4   :  { %v97_v7 = vld [vmem:[%s2283_s1 + $0x1e8] sm:$0xff]  ;;  %101 = vmatpush.msra.mxu0 %v64_v4  ;;  %v94_v9 = vld [vmem:[%s2283_s1 + $0x1d0] sm:$0xff]  ;;  %v95_v11 = vld [vmem:[%s2283_s1 + $0x1d8] sm:$0xff]  ;;  %183 = vmatpush.msra.mxu2 %v65_v6 }
   0x5   :  { %142 = vmatpush.msra.mxu1 %v96_v5  ;;  %224 = vmatpush.msra.mxu3 %v97_v7  ;;  %v60_v12 = vld [vmem:[%s2283_s1 + $0xc0] sm:$0xff]  ;;  %v61_v14 = vld [vmem:[%s2283_s1 + $0xc8] sm:$0xff]  ;;  %v58_v16 = vld [vmem:[%s2283_s1 + $0xb0] sm:$0xff] }
   0x6   :  { %v92_v13 = vld [vmem:[%s2283_s1 + $0x1c0] sm:$0xff]  ;;  %102 = vmatpush.msra.mxu0 %v62_v8  ;;  %v93_v15 = vld [vmem:[%s2283_s1 + $0x1c8] sm:$0xff]  ;;  %184 = vmatpush.msra.mxu2 %v63_v10  ;;  %v90_v17 = vld [vmem:[%s2283_s1 + $0x1b0] sm:$0xff] }
   0x7   :  { %143 = vmatpush.msra.mxu1 %v94_v9  ;;  %225 = vmatpush.msra.mxu3 %v95_v11  ;;  %v59_v18 = vld [vmem:[%s2283_s1 + $0xb8] sm:$0xff]  ;;  %v56_v20 = vld [vmem:[%s2283_s1 + $0xa0] sm:$0xff]  ;;  %v57_v22 = vld [vmem:[%s2283_s1 + $0xa8] sm:$0xff] }
   0x8   :  { %103 = vmatpush.msra.mxu0 %v60_v12  ;;  %v91_v19 = vld [vmem:[%s2283_s1 + $0x1b8] sm:$0xff]  ;;  %185 = vmatpush.msra.mxu2 %v61_v14  ;;  %v88_v21 = vld [vmem:[%s2283_s1 + $0x1a0] sm:$0xff]  ;;  %v89_v23 = vld [vmem:[%s2283_s1 + $0x1a8] sm:$0xff] }
   0x9   :  { %144 = vmatpush.msra.mxu1 %v92_v13  ;;  %226 = vmatpush.msra.mxu3 %v93_v15  ;;  %v54_v24 = vld [vmem:[%s2283_s1 + $0x90] sm:$0xff]  ;;  %v55_v26 = vld [vmem:[%s2283_s1 + $0x98] sm:$0xff]  ;;  %v52_v28 = vld [vmem:[%s2283_s1 + $0x80] sm:$0xff] }
   0xa   :  { %104 = vmatpush.msra.mxu0 %v58_v16  ;;  %186 = vmatpush.msra.mxu2 %v59_v18  ;;  %v86_v25 = vld [vmem:[%s2283_s1 + $0x190] sm:$0xff]  ;;  %v87_v27 = vld [vmem:[%s2283_s1 + $0x198] sm:$0xff]  ;;  %v84_v29 = vld [vmem:[%s2283_s1 + $0x180] sm:$0xff] }
   0xb   :  { %145 = vmatpush.msra.mxu1 %v90_v17  ;;  %227 = vmatpush.msra.mxu3 %v91_v19  ;;  %v53_v30 = vld [vmem:[%s2283_s1 + $0x88] sm:$0xff]  ;;  %v50_v32 = vld [vmem:[%s2283_s1 + $0x70] sm:$0xff]  ;;  %v51_v34 = vld [vmem:[%s2283_s1 + $0x78] sm:$0xff] }
   0xc   :  { %105 = vmatpush.msra.mxu0 %v56_v20  ;;  %187 = vmatpush.msra.mxu2 %v57_v22  ;;  %v85_v31 = vld [vmem:[%s2283_s1 + $0x188] sm:$0xff]  ;;  %v82_v33 = vld [vmem:[%s2283_s1 + $0x170] sm:$0xff]  ;;  %v83_v35 = vld [vmem:[%s2283_s1 + $0x178] sm:$0xff] }
   0xd   :  { %146 = vmatpush.msra.mxu1 %v88_v21  ;;  %228 = vmatpush.msra.mxu3 %v89_v23  ;;  %v48_v36 = vld [vmem:[%s2283_s1 + $0x60] sm:$0xff]  ;;  %v49_v38 = vld [vmem:[%s2283_s1 + $0x68] sm:$0xff]  ;;  %v46_v40 = vld [vmem:[%s2283_s1 + $0x50] sm:$0xff] }
   0xe   :  { %106 = vmatpush.msra.mxu0 %v54_v24  ;;  %188 = vmatpush.msra.mxu2 %v55_v26  ;;  %v80_v37 = vld [vmem:[%s2283_s1 + $0x160] sm:$0xff]  ;;  %v81_v39 = vld [vmem:[%s2283_s1 + $0x168] sm:$0xff]  ;;  %v78_v41 = vld [vmem:[%s2283_s1 + $0x150] sm:$0xff] }
   0xf   :  { %147 = vmatpush.msra.mxu1 %v86_v25  ;;  %229 = vmatpush.msra.mxu3 %v87_v27  ;;  %v47_v42 = vld [vmem:[%s2283_s1 + $0x58] sm:$0xff]  ;;  %v44_v44 = vld [vmem:[%s2283_s1 + $0x40] sm:$0xff]  ;;  %v45_v46 = vld [vmem:[%s2283_s1 + $0x48] sm:$0xff] }
  0x10   :  { %107 = vmatpush.msra.mxu0 %v52_v28  ;;  %189 = vmatpush.msra.mxu2 %v53_v30  ;;  %v79_v43 = vld [vmem:[%s2283_s1 + $0x158] sm:$0xff]  ;;  %v76_v45 = vld [vmem:[%s2283_s1 + $0x140] sm:$0xff]  ;;  %v77_v47 = vld [vmem:[%s2283_s1 + $0x148] sm:$0xff] }
  0x11   :  { %148 = vmatpush.msra.mxu1 %v84_v29  ;;  %230 = vmatpush.msra.mxu3 %v85_v31  ;;  %v42_v48 = vld [vmem:[%s2283_s1 + $0x30] sm:$0xff]  ;;  %v43_v50 = vld [vmem:[%s2283_s1 + $0x38] sm:$0xff] }
  0x12   :  { %108 = vmatpush.msra.mxu0 %v50_v32  ;;  %190 = vmatpush.msra.mxu2 %v51_v34  ;;  %v74_v49 = vld [vmem:[%s2283_s1 + $0x130] sm:$0xff]  ;;  %v75_v51 = vld [vmem:[%s2283_s1 + $0x138] sm:$0xff] }
  0x13   :  { %149 = vmatpush.msra.mxu1 %v82_v33  ;;  %231 = vmatpush.msra.mxu3 %v83_v35 }
  0x14   :  { %109 = vmatpush.msra.mxu0 %v48_v36  ;;  %191 = vmatpush.msra.mxu2 %v49_v38 }
  0x15   :  { %150 = vmatpush.msra.mxu1 %v80_v37  ;;  %232 = vmatpush.msra.mxu3 %v81_v39 }
  0x16   :  { %110 = vmatpush.msra.mxu0 %v46_v40  ;;  %192 = vmatpush.msra.mxu2 %v47_v42 }
  0x17   :  { %151 = vmatpush.msra.mxu1 %v78_v41  ;;  %233 = vmatpush.msra.mxu3 %v79_v43 }
  0x18   :  { %111 = vmatpush.msra.mxu0 %v44_v44 }
  0x19   :  { %152 = vmatpush.msra.mxu1 %v76_v45 }
  0x1a   :  { %11 = vsyncpa [#allocation3], 0  ;;  %193 = vmatpush.msra.mxu2 %v45_v46  ;;  %234 = vmatpush.msra.mxu3 %v77_v47  ;;  %v40_v52 = vld [vmem:[%s2283_s1 + $0x20] sm:$0xff]  ;;  %v41_v54 = vld [vmem:[%s2283_s1 + $0x28] sm:$0xff]  ;;  %s1283_s26 = smov 64   ;;  %vm389_vm5 = vcmask 1043456  }
  0x1b   :  { %v72_v53 = vld [vmem:[%s2283_s1 + $0x120] sm:$0xff]  ;;  %112 = vmatpush.msra.mxu0 %v42_v48  ;;  %153 = vmatpush.msra.mxu1 %v74_v49  ;;  %v73_v55 = vld [vmem:[%s2283_s1 + $0x128] sm:$0xff]  ;;  %v38_v56 = vld [vmem:[%s2283_s1 + $0x10] sm:$0xff]  ;;  %vm500_vm6 = vcmask 130048   ;;  %s1194_s12 = sshll.u32 %s2287_s5, 4  ;;  %s1285_s13 = smov 128   ;;  %s1195_s12 = int_to_ptr.hbm [resolvable:$true] %s1194_s12 }
  0x1c   :  { %194 = vmatpush.msra.mxu2 %v43_v50  ;;  %235 = vmatpush.msra.mxu3 %v75_v51  ;;  %v70_v57 = vld [vmem:[%s2283_s1 + $0x110] sm:$0xff]  ;;  %v39_v58 = vld [vmem:[%s2283_s1 + $0x18] sm:$0xff]  ;;  %v36_v60 = vld [vmem:[%s2283_s1] sm:$0xff]  ;;  %s1286_s14 = smov 8  }
  0x1d   :  { %113 = vmatpush.msra.mxu0 %v40_v52  ;;  %154 = vmatpush.msra.mxu1 %v72_v53  ;;  %v71_v59 = vld [vmem:[%s2283_s1 + $0x118] sm:$0xff]  ;;  %v68_v61 = vld [vmem:[%s2283_s1 + $0x100] sm:$0xff]  ;;  %v37_v62 = vld [vmem:[%s2283_s1 + $0x8] sm:$0xff] }
  0x1e   :  { %195 = vmatpush.msra.mxu2 %v41_v54  ;;  %236 = vmatpush.msra.mxu3 %v73_v55  ;;  %v69_v63 = vld [vmem:[%s2283_s1 + $0x108] sm:$0xff]  ;;  %v20_v0 = vld [vmem:[%s2282_s0] sm:$0xff]  ;;  %v22_v2 = vld [vmem:[%s2282_s0 + $0x10] sm:$0xff] }
  0x1f   :  { %114 = vmatpush.msra.mxu0 %v38_v56  ;;  %155 = vmatpush.msra.mxu1 %v70_v57  ;;  %v21_v1 = vld [vmem:[%s2282_s0 + $0x8] sm:$0xff]  ;;  %v23_v3 = vld [vmem:[%s2282_s0 + $0x18] sm:$0xff]  ;;  %v24_v4 = vld [vmem:[%s2282_s0 + $0x20] sm:$0xff] }
  0x20   :  { %196 = vmatpush.msra.mxu2 %v39_v58  ;;  %237 = vmatpush.msra.mxu3 %v71_v59  ;;  %v25_v5 = vld [vmem:[%s2282_s0 + $0x28] sm:$0xff]  ;;  %v26_v6 = vld [vmem:[%s2282_s0 + $0x30] sm:$0xff]  ;;  %v27_v7 = vld [vmem:[%s2282_s0 + $0x38] sm:$0xff] }
  0x21   :  { %115 = vmatpush.msra.mxu0 %v36_v60  ;;  %156 = vmatpush.msra.mxu1 %v68_v61  ;;  %v28_v8 = vld [vmem:[%s2282_s0 + $0x40] sm:$0xff]  ;;  %v29_v9 = vld [vmem:[%s2282_s0 + $0x48] sm:$0xff]  ;;  %v30_v10 = vld [vmem:[%s2282_s0 + $0x50] sm:$0xff] }
  0x22   :  { %197 = vmatpush.msra.mxu2 %v37_v62  ;;  %238 = vmatpush.msra.mxu3 %v69_v63  ;;  %v31_v11 = vld [vmem:[%s2282_s0 + $0x58] sm:$0xff]  ;;  %v32_v12 = vld [vmem:[%s2282_s0 + $0x60] sm:$0xff]  ;;  %v33_v13 = vld [vmem:[%s2282_s0 + $0x68] sm:$0xff] }
  0x23   :  { %116 = vmatmul.f32.vlgmr.msra.gmra.mxu0 %v20_v0  ;;  %157 = vmatmul.f32.vlgmr.msra.gmra.mxu1 %v21_v1  ;;  %v34_v14 = vld [vmem:[%s2282_s0 + $0x70] sm:$0xff]  ;;  %v35_v15 = vld [vmem:[%s2282_s0 + $0x78] sm:$0xff]  ;;  %s1282_s0 = smov 32  }
  0x24   :  { %198 = vmatmul.f32.vlgmr.msra.gmra.mxu2 %v20_v0  ;;  %239 = vmatmul.f32.vlgmr.msra.gmra.mxu3 %v21_v1 }
  0x2b   :  { %119 = vmatmul.f32.gmra.mxu0 %v22_v2  ;;  %160 = vmatmul.f32.gmra.mxu1 %v23_v3 }
  0x2c   :  { %201 = vmatmul.f32.gmra.mxu2 %v22_v2  ;;  %242 = vmatmul.f32.gmra.mxu3 %v23_v3 }
  0x33   :  { %122 = vmatmul.f32.gmra.mxu0 %v24_v4  ;;  %163 = vmatmul.f32.gmra.mxu1 %v25_v5 }
  0x34   :  { %204 = vmatmul.f32.gmra.mxu2 %v24_v4  ;;  %245 = vmatmul.f32.gmra.mxu3 %v25_v5 }
  0x3b   :  { %125 = vmatmul.f32.gmra.mxu0 %v26_v6  ;;  %166 = vmatmul.f32.gmra.mxu1 %v27_v7 }
  0x3c   :  { %207 = vmatmul.f32.gmra.mxu2 %v26_v6  ;;  %248 = vmatmul.f32.gmra.mxu3 %v27_v7 }
  0x43   :  { %128 = vmatmul.f32.gmra.mxu0 %v28_v8  ;;  %169 = vmatmul.f32.gmra.mxu1 %v29_v9 }
  0x44   :  { %210 = vmatmul.f32.gmra.mxu2 %v28_v8  ;;  %251 = vmatmul.f32.gmra.mxu3 %v29_v9 }
  0x4b   :  { %131 = vmatmul.f32.gmra.mxu0 %v30_v10  ;;  %172 = vmatmul.f32.gmra.mxu1 %v31_v11 }
  0x4c   :  { %213 = vmatmul.f32.gmra.mxu2 %v30_v10  ;;  %254 = vmatmul.f32.gmra.mxu3 %v31_v11 }
  0x53   :  { %134 = vmatmul.f32.gmra.mxu0 %v32_v12  ;;  %175 = vmatmul.f32.gmra.mxu1 %v33_v13 }
  0x54   :  { %216 = vmatmul.f32.gmra.mxu2 %v32_v12  ;;  %257 = vmatmul.f32.gmra.mxu3 %v33_v13 }
  0x5b   :  { %137 = vmatmul.f32.gmra.mxu0 %v34_v14  ;;  %178 = vmatmul.f32.gmra.mxu1 %v35_v15 }
  0x5c   :  { %219 = vmatmul.f32.gmra.mxu2 %v34_v14  ;;  %260 = vmatmul.f32.gmra.mxu3 %v35_v15 }
  0xa0   :  { %v117_v16 = vpop.f32.mrf.mxu0  ;;  %v158_v17 = vpop.f32.mrf.mxu1 }
  0xa1   :  { %v1559_v39 = vadd.f32 %v158_v17, %v117_v16 }
  0xa3   :  { %v290_v43 = vmul.f32 %v1559_v39, %v1559_v39 }
  0xa7   :  { %v199_v18 = vpop.f32.mrf.mxu2  ;;  %v240_v19 = vpop.f32.mrf.mxu3 }
  0xa8   :  { %v120_v20 = vpop.f32.mrf.mxu0  ;;  %v161_v21 = vpop.f32.mrf.mxu1  ;;  %v1582_v56 = vadd.f32 %v240_v19, %v199_v18 }
  0xa9   :  { %v1557_v38 = vadd.f32 %v161_v21, %v120_v20 }
  0xaa   :  { %v291_v3 = vmul.f32 %v1582_v56, %v1582_v56 }
  0xab   :  { %v292_v41 = vmul.f32 %v1557_v38, %v1557_v38  ;;  %v264_v44 = vadd.f32 %v1557_v38, %v1559_v39 }
  0xad   :  { %v306_v52 = vadd.f32 %v292_v41, %v290_v43 }
  0xaf   :  { %v202_v22 = vpop.f32.mrf.mxu2  ;;  %v243_v23 = vpop.f32.mrf.mxu3 }
  0xb0   :  { %v123_v24 = vpop.f32.mrf.mxu0  ;;  %v164_v25 = vpop.f32.mrf.mxu1  ;;  %v1575_v49 = vadd.f32 %v243_v23, %v202_v22 }
  0xb1   :  { %v1561_v40 = vadd.f32 %v164_v25, %v123_v24 }
  0xb2   :  { %v293_v62 = vmul.f32 %v1575_v49, %v1575_v49  ;;  %v277_v4 = vadd.f32 %v1575_v49, %v1582_v56 }
  0xb3   :  { %v294_v45 = vmul.f32 %v1561_v40, %v1561_v40  ;;  %v265_v53 = vadd.f32 %v264_v44, %v1561_v40 }
  0xb4   :  { %v319_v12 = vadd.f32 %v293_v62, %v291_v3 }
  0xb5   :  { %v307_v58 = vadd.f32 %v306_v52, %v294_v45 }
  0xb7   :  { %v205_v26 = vpop.f32.mrf.mxu2  ;;  %v246_v27 = vpop.f32.mrf.mxu3 }
  0xb8   :  { %v126_v28 = vpop.f32.mrf.mxu0  ;;  %v167_v29 = vpop.f32.mrf.mxu1  ;;  %v1584_v57 = vadd.f32 %v246_v27, %v205_v26 }
  0xb9   :  { %v1565_v42 = vadd.f32 %v167_v29, %v126_v28 }
  0xba   :  { %v295_v5 = vmul.f32 %v1584_v57, %v1584_v57  ;;  %v278_v13 = vadd.f32 %v277_v4, %v1584_v57 }
  0xbb   :  { %v296_v54 = vmul.f32 %v1565_v42, %v1565_v42  ;;  %v266_v59 = vadd.f32 %v265_v53, %v1565_v42 }
  0xbc   :  { %v320_v21 = vadd.f32 %v319_v12, %v295_v5 }
  0xbd   :  { %v308_v0 = vadd.f32 %v307_v58, %v296_v54 }
  0xbf   :  { %v208_v30 = vpop.f32.mrf.mxu2  ;;  %v249_v31 = vpop.f32.mrf.mxu3 }
  0xc0   :  { %v129_v32 = vpop.f32.mrf.mxu0  ;;  %v170_v33 = vpop.f32.mrf.mxu1  ;;  %v1593_v63 = vadd.f32 %v249_v31, %v208_v30 }
  0xc1   :  { %v1573_v46 = vadd.f32 %v170_v33, %v129_v32 }
  0xc2   :  { %v297_v14 = vmul.f32 %v1593_v63, %v1593_v63  ;;  %v279_v22 = vadd.f32 %v278_v13, %v1593_v63 }
  0xc3   :  { %v298_v60 = vmul.f32 %v1573_v46, %v1573_v46  ;;  %v267_v1 = vadd.f32 %v266_v59, %v1573_v46 }
  0xc4   :  { %v321_v28 = vadd.f32 %v320_v21, %v297_v14 }
  0xc5   :  { %v309_v7 = vadd.f32 %v308_v0, %v298_v60 }
  0xc7   :  { %v211_v34 = vpop.f32.mrf.mxu2  ;;  %v252_v35 = vpop.f32.mrf.mxu3 }
  0xc8   :  { %v132_v36 = vpop.f32.mrf.mxu0  ;;  %v173_v37 = vpop.f32.mrf.mxu1  ;;  %v1604_v6 = vadd.f32 %v252_v35, %v211_v34 }
  0xc9   :  { %v1580_v55 = vadd.f32 %v173_v37, %v132_v36 }
  0xca   :  { %v299_v23 = vmul.f32 %v1604_v6, %v1604_v6  ;;  %v280_v29 = vadd.f32 %v279_v22, %v1604_v6 }
  0xcb   :  { %v300_v2 = vmul.f32 %v1580_v55, %v1580_v55  ;;  %v268_v8 = vadd.f32 %v267_v1, %v1580_v55 }
  0xcc   :  { %v322_v33 = vadd.f32 %v321_v28, %v299_v23 }
  0xcd   :  { %v310_v18 = vadd.f32 %v309_v7, %v300_v2 }
  0xcf   :  { %v214_v47 = vpop.f32.mrf.mxu2  ;;  %v255_v48 = vpop.f32.mrf.mxu3 }
  0xd0   :  { %v135_v50 = vpop.f32.mrf.mxu0  ;;  %v176_v51 = vpop.f32.mrf.mxu1  ;;  %v1612_v15 = vadd.f32 %v255_v48, %v214_v47 }
  0xd1   :  { %v1589_v61 = vadd.f32 %v176_v51, %v135_v50 }
  0xd2   :  { %v301_v30 = vmul.f32 %v1612_v15, %v1612_v15  ;;  %v281_v34 = vadd.f32 %v280_v29, %v1612_v15 }
  0xd3   :  { %v302_v9 = vmul.f32 %v1589_v61, %v1589_v61  ;;  %v269_v19 = vadd.f32 %v268_v8, %v1589_v61 }
  0xd4   :  { %v323_v44 = vadd.f32 %v322_v33, %v301_v30 }
  0xd5   :  { %v311_v25 = vadd.f32 %v310_v18, %v302_v9 }
  0xd7   :  { %v217_v10 = vpop.f32.mrf.mxu2  ;;  %v258_v11 = vpop.f32.mrf.mxu3 }
  0xd8   :  { %v138_v16 = vpop.f32.mrf.mxu0  ;;  %v179_v17 = vpop.f32.mrf.mxu1  ;;  %v1620_v24 = vadd.f32 %v258_v11, %v217_v10 }
  0xd9   :  { %v1615_v20 = vadd.f32 %v179_v17, %v138_v16  ;;  %v336_v17 = vlaneseq }
  0xda   :  { %v303_v35 = vmul.f32 %v1620_v24, %v1620_v24  ;;  %v282_v45 = vadd.f32 %v281_v34, %v1620_v24 }
  0xdb   :  { %v270_v26 = vadd.f32 %v269_v19, %v1615_v20  ;;  %v304_v27 = vmul.f32 %v1615_v20, %v1615_v20  ;;  %v337_v21 = vand.u32 127, %v336_v17 }
  0xdc   :  { %v324_v51 = vadd.f32 %v323_v44, %v303_v35 }
  0xdd   :  { %v271_v31 = vrot.slane %v270_v26, 4  ;;  %v312_v32 = vadd.f32 %v311_v25, %v304_v27  ;;  %vm338_vm0 = vcmp.lt.s32.totalorder %v337_v21, 32  ;;  %vm347_vm1 = vcmp.lt.s32.totalorder %v337_v21, 64 }
  0xdf   :  { %v220_v36 = vpop.f32.mrf.mxu2  ;;  %v261_v37 = vpop.f32.mrf.mxu3  ;;  %v272_v41 = vadd.f32 %v271_v31, %v270_v26  ;;  %v313_v43 = vrot.slane %v312_v32, 4 }
  0xe0   :  { %v1632_v47 = vadd.f32 %v261_v37, %v220_v36 }
  0xe1   :  { %v273_v48 = vrot.slane %v272_v41, 2  ;;  %v314_v50 = vadd.f32 %v313_v43, %v312_v32 }
  0xe2   :  { %v283_v52 = vadd.f32 %v282_v45, %v1632_v47  ;;  %v305_v53 = vmul.f32 %v1632_v47, %v1632_v47 }
  0xe3   :  { %v274_v54 = vadd.f32 %v273_v48, %v272_v41  ;;  %v315_v58 = vrot.slane %v314_v50, 2 }
  0xe4   :  { %v284_v59 = vrot.slane %v283_v52, 4  ;;  %v325_v60 = vadd.f32 %v324_v51, %v305_v53 }
  0xe5   :  { %v275_v62 = vrot.slane %v274_v54, 1  ;;  %v316_v0 = vadd.f32 %v315_v58, %v314_v50 }
  0xe6   :  { %v285_v1 = vadd.f32 %v284_v59, %v283_v52  ;;  %v326_v2 = vrot.slane %v325_v60, 4 }
  0xe7   :  { %v276_v3 = vadd.f32 %v275_v62, %v274_v54  ;;  %v317_v4 = vrot.slane %v316_v0, 1 }
  0xe8   :  { %v286_v5 = vrot.slane %v285_v1, 2  ;;  %v327_v7 = vadd.f32 %v326_v2, %v325_v60 }
  0xe9   :  { %332 = vrot.lane.b32.xlu0 %v276_v3, %s1282_s0  ;;  %v318_v8 = vadd.f32 %v317_v4, %v316_v0 }
  0xea   :  { %v287_v9 = vadd.f32 %v286_v5, %v285_v1  ;;  %v328_v10 = vrot.slane %v327_v7, 2 }
  0xeb   :  { %354 = vrot.lane.b32.xlu1 %v318_v8, %s1282_s0 }
  0xec   :  { %v288_v11 = vrot.slane %v287_v9, 1  ;;  %v329_v12 = vadd.f32 %v328_v10, %v327_v7 }
  0xee   :  { %v330_v13 = vrot.slane %v329_v12, 1  ;;  %v289_v14 = vadd.f32 %v288_v11, %v287_v9  ;;  %v375_v9 = vld [vmem:[%s2284_s2] sm:$0x77] }
  0xf0   :  { %v331_v16 = vadd.f32 %v330_v13, %v329_v12 }
  0xf1   :  { %334 = vrot.lane.b32.xlu0 %v289_v14, %s1282_s0 }
  0xf3   :  { %356 = vrot.lane.b32.xlu1 %v331_v16, %s1282_s0 }
 0x15b   :  { %v333_v18 = vpop.permute.xlu0 %332 }
 0x15d   :  { %v355_v19 = vpop.permute.xlu1 %354 }
 0x163   :  { %v335_v22 = vpop.permute.xlu0 %334 }
 0x164   :  { %v340_v23 = vsel %vm338_vm0, %v335_v22, %v333_v18  ;;  %v339_v31 = vsel %vm338_vm0, %v333_v18, %v335_v22 }
 0x165   :  { %v357_v25 = vpop.permute.xlu1 %356  ;;  %v341_v26 = vadd.f32 %v340_v23, %v276_v3  ;;  %v342_v32 = vadd.f32 %v339_v31, %v289_v14 }
 0x166   :  { %v358_v27 = vsel %vm338_vm0, %v355_v19, %v357_v25  ;;  %v359_v28 = vsel %vm338_vm0, %v357_v25, %v355_v19 }
 0x167   :  { %v360_v29 = vadd.f32 %v359_v28, %v318_v8  ;;  %v361_v30 = vadd.f32 %v358_v27, %v331_v16  ;;  %343 = vrot.lane.b32.xlu2 %v341_v26, %s1283_s26 }
 0x169   :  { %364 = vrot.lane.b32.xlu1 %v361_v30, %s1283_s26  ;;  %362 = vrot.lane.b32.xlu0 %v360_v29, %s1283_s26 }
 0x16f   :  { %345 = vrot.lane.b32.xlu2 %v342_v32, %s1283_s26 }
 0x1c1   :  { %v344_v33 = vpop.permute.xlu2 %343 }
 0x1c9   :  { %v346_v34 = vpop.permute.xlu2 %345 }
 0x1ca   :  { %v348_v35 = vsel %vm347_vm1, %v344_v33, %v346_v34  ;;  %v349_v36 = vsel %vm347_vm1, %v346_v34, %v344_v33 }
 0x1cb   :  { %v350_v37 = vadd.f32 %v349_v36, %v341_v26  ;;  %v351_v41 = vadd.f32 %v348_v35, %v342_v32 }
 0x1cd   :  { %v352_v43 = vadd.f32 %v351_v41, %v350_v37 }
 0x1cf   :  { %v353_v51 = vmul.f32 0.001953125, %v352_v43 }
 0x1d1   :  { %v372_v58 = vmul.f32 %v353_v51, %v353_v51 }
 0x1db   :  { %v365_v44 = vpop.permute.xlu1 %364  ;;  %v363_v45 = vpop.permute.xlu0 %362 }
 0x1dc   :  { %v366_v48 = vsel %vm347_vm1, %v363_v45, %v365_v44  ;;  %v367_v50 = vsel %vm347_vm1, %v365_v44, %v363_v45 }
 0x1dd   :  { %v368_v52 = vadd.f32 %v367_v50, %v360_v29  ;;  %v369_v53 = vadd.f32 %v366_v48, %v361_v30 }
 0x1df   :  { %v370_v54 = vadd.f32 %v369_v53, %v368_v52 }
 0x1e1   :  { %v371_v59 = vmul.f32 0.001953125, %v370_v54 }
 0x1e3   :  { %v373_v60 = vsub.f32 %v371_v59, %v372_v58 }
 0x1e5   :  { %v374_v62 = vmax.f32 %v373_v60, 0.0 }
 0x1e7   :  { %v376_v0 = vadd.f32 1e-05, %v374_v62 }
 0x1e9   :  { %1253 = vrsqrt.f32 %v376_v0  ;;  %vm383_vm3 = vweird.f32 %v376_v0 }
 0x1ef   :  { %v1254_v1 = vpop.eup %1253 }
 0x1f0   :  { %v378_v2 = vmul.f32 %v1254_v1, %v376_v0  ;;  %vm384_vm2 = vweird.f32 %v1254_v1 }
 0x1f1   :  { %vm385_vm4 = vmor %vm383_vm3, %vm384_vm2 }
 0x1f2   :  { %v379_v3 = vmul.f32 %v1254_v1, %v378_v2 }
 0x1f4   :  { %v380_v4 = vmul.f32 0.5, %v379_v3 }
 0x1f6   :  { %v381_v5 = vsub.f32 1.5, %v380_v4 }
 0x1f8   :  { %v382_v7 = vmul.f32 %v1254_v1, %v381_v5 }
 0x1fa   :  { %v386_v8 = vsel %vm385_vm4, %v1254_v1, %v382_v7 }
 0x1fb   :  { %v388_v10 = vrot.slane %v386_v8, 4 }
 0x1fd   :  { %v390_v11 = vsel %vm389_vm5, %v386_v8, %v388_v10 }
 0x1fe   :  { %v392_v12 = vmul.f32 %v390_v11, %v375_v9 }
 0x200   :  { %v394_v13 = vperm.slane %v392_v12, 0  ;;  %v395_v14 = vperm.slane %v392_v12, 4 }
 0x202   :  { %v399_v16 = vmul.f32 %v395_v14, %v353_v51  ;;  %v398_v17 = vmul.f32 %v394_v13, %v353_v51  ;;  %v407_v21 = vperm.slane %v394_v13, 0  ;;  %v408_v23 = vperm.slane %v395_v14, 0 }
 0x204   :  { %v402_v18 = vrot.slane %v399_v16, 4  ;;  %v411_v26 = vmul.f32 %v407_v21, %v1557_v38  ;;  %v415_v27 = vmul.f32 %v407_v21, %v1565_v42  ;;  %v419_v28 = vmul.f32 %v407_v21, %v1580_v55 }
 0x205   :  { %v423_v29 = vmul.f32 %v407_v21, %v1615_v20  ;;  %v412_v32 = vmul.f32 %v408_v23, %v1575_v49  ;;  %v416_v33 = vmul.f32 %v408_v23, %v1593_v63  ;;  %v420_v34 = vmul.f32 %v408_v23, %v1612_v15 }
 0x206   :  { %v403_v19 = vsel %vm389_vm5, %v398_v17, %v402_v18  ;;  %v424_v35 = vmul.f32 %v408_v23, %v1632_v47  ;;  %v409_v36 = vmul.f32 %v407_v21, %v1559_v39  ;;  %v413_v38 = vmul.f32 %v407_v21, %v1561_v40 }
 0x207   :  { %v404_v22 = vrot.slane %v403_v19, 7  ;;  %v417_v55 = vmul.f32 %v407_v21, %v1573_v46  ;;  %v421_v20 = vmul.f32 %v407_v21, %v1589_v61  ;;  %v410_v41 = vmul.f32 %v408_v23, %v1582_v56 }
 0x208   :  { %v414_v49 = vmul.f32 %v408_v23, %v1584_v57  ;;  %v418_v63 = vmul.f32 %v408_v23, %v1604_v6  ;;  %v422_v15 = vmul.f32 %v408_v23, %v1620_v24  ;;  %v480_v23 = vld [vmem:[%s2285_s3] sm:$0xff] }
 0x209   :  { %v406_v25 = vsub.f32 %v375_v9, %v404_v22 }
 0x20b   :  { %v426_v30 = vperm.slane %v406_v25, 1  ;;  %v427_v31 = vperm.slane %v406_v25, 5 }
 0x20d   :  { %v430_v37 = vperm.slane %v426_v30, 1  ;;  %v431_v42 = vperm.slane %v427_v31, 1  ;;  %v484_v30 = vld [vmem:[%s2285_s3 + $0x20] sm:$0xff]  ;;  %v485_v31 = vld [vmem:[%s2285_s3 + $0x28] sm:$0xff] }
 0x20f   :  { %v434_v43 = vadd.f32 %v430_v37, %v411_v26  ;;  %v438_v47 = vadd.f32 %v430_v37, %v415_v27  ;;  %v442_v44 = vadd.f32 %v430_v37, %v419_v28  ;;  %v446_v39 = vadd.f32 %v430_v37, %v423_v29  ;;  %v481_v27 = vld [vmem:[%s2285_s3 + $0x8] sm:$0xff]  ;;  %v482_v28 = vld [vmem:[%s2285_s3 + $0x10] sm:$0xff]  ;;  %v483_v29 = vld [vmem:[%s2285_s3 + $0x18] sm:$0xff] }
 0x210   :  { %v435_v45 = vadd.f32 %v431_v42, %v412_v32  ;;  %v439_v40 = vadd.f32 %v431_v42, %v416_v33  ;;  %v443_v48 = vadd.f32 %v431_v42, %v420_v34  ;;  %v447_v50 = vadd.f32 %v431_v42, %v424_v35  ;;  %v486_v32 = vld [vmem:[%s2285_s3 + $0x30] sm:$0xff]  ;;  %v487_v33 = vld [vmem:[%s2285_s3 + $0x38] sm:$0xff]  ;;  %v488_v34 = vld [vmem:[%s2285_s3 + $0x40] sm:$0xff] }
 0x211   :  { %v450_v51 = vmax.f32 %v434_v43, 0.0  ;;  %v454_v46 = vmax.f32 %v438_v47, 0.0  ;;  %v458_v52 = vmax.f32 %v442_v44, 0.0  ;;  %v462_v61 = vmax.f32 %v446_v39, 0.0  ;;  %v489_v35 = vld [vmem:[%s2285_s3 + $0x48] sm:$0xff]  ;;  %v775_v43 = vld [vmem:[%s2285_s3 + $0x280] sm:$0xff] }
 0x212   :  { %v451_v53 = vmax.f32 %v435_v45, 0.0  ;;  %v455_v56 = vmax.f32 %v439_v40, 0.0  ;;  %v459_v54 = vmax.f32 %v443_v48, 0.0  ;;  %v463_v57 = vmax.f32 %v447_v50, 0.0  ;;  %v758_v47 = vld [vmem:[%s2285_s3 + $0x1f8] sm:$0xff]  ;;  %v493_v39 = vld [vmem:[%s2285_s3 + $0x68] sm:$0xff] }
 0x213   :  { %v466_v58 = vmax.f32 %v450_v51, %v454_v46  ;;  %v470_v6 = vmax.f32 %v458_v52, %v462_v61  ;;  %v432_v59 = vadd.f32 %v430_v37, %v409_v36  ;;  %v436_v24 = vadd.f32 %v430_v37, %v413_v38  ;;  %v490_v36 = vld [vmem:[%s2285_s3 + $0x50] sm:$0xff]  ;;  %v491_v38 = vld [vmem:[%s2285_s3 + $0x58] sm:$0xff]  ;;  %v756_v48 = vld [vmem:[%s2285_s3 + $0x1e8] sm:$0xff] }
 0x214   :  { %v467_v60 = vmax.f32 %v451_v53, %v455_v56  ;;  %v471_v62 = vmax.f32 %v459_v54, %v463_v57  ;;  %v440_v0 = vadd.f32 %v430_v37, %v417_v55  ;;  %v444_v1 = vadd.f32 %v430_v37, %v421_v20  ;;  %v762_v37 = vld [vmem:[%s2285_s3 + $0x218] sm:$0xff]  ;;  %v492_v55 = vld [vmem:[%s2285_s3 + $0x60] sm:$0xff]  ;;  %v761_v20 = vld [vmem:[%s2285_s3 + $0x210] sm:$0xff] }
 0x215   :  { %v474_v2 = vmax.f32 %v466_v58, %v470_v6  ;;  %v448_v3 = vmax.f32 %v432_v59, 0.0  ;;  %v452_v4 = vmax.f32 %v436_v24, 0.0  ;;  %v433_v5 = vadd.f32 %v431_v42, %v410_v41  ;;  %779 = vmatpush.msrb.mxu2 %v762_v37  ;;  %v777_v41 = vld [vmem:[%s2285_s3 + $0x290] sm:$0xff]  ;;  %v774_v44 = vld [vmem:[%s2285_s3 + $0x278] sm:$0xff]  ;;  %v772_v50 = vld [vmem:[%s2285_s3 + $0x268] sm:$0xff] }
 0x216   :  { %v475_v7 = vmax.f32 %v467_v60, %v471_v62  ;;  %v456_v8 = vmax.f32 %v440_v0, 0.0  ;;  %v460_v9 = vmax.f32 %v444_v1, 0.0  ;;  %v437_v10 = vadd.f32 %v431_v42, %v414_v49  ;;  %v760_v49 = vld [vmem:[%s2285_s3 + $0x208] sm:$0xff]  ;;  %v757_v45 = vld [vmem:[%s2285_s3 + $0x1f0] sm:$0xff]  ;;  %v755_v51 = vld [vmem:[%s2285_s3 + $0x1e0] sm:$0xff] }
 0x217   :  { %478 = vst [vmem:[%s2286_s4 + $0x10] sm:$0xff] %v474_v2  ;;  %575 = vmatpush.msrb.mxu0 %v474_v2  ;;  %v464_v11 = vmax.f32 %v448_v3, %v452_v4  ;;  %v441_v12 = vadd.f32 %v431_v42, %v418_v63  ;;  %v445_v13 = vadd.f32 %v431_v42, %v422_v15  ;;  %v449_v14 = vmax.f32 %v433_v5, 0.0  ;;  %v778_v42 = vld [vmem:[%s2285_s3 + $0x298] sm:$0xff]  ;;  %v776_v63 = vld [vmem:[%s2285_s3 + $0x288] sm:$0xff]  ;;  %v759_v15 = vld [vmem:[%s2285_s3 + $0x200] sm:$0xff] }
 0x218   :  { %479 = vst [vmem:[%s2286_s4 + $0x18] sm:$0xff] %v475_v7  ;;  %652 = vmatpush.msrb.mxu1 %v475_v7  ;;  %v468_v16 = vmax.f32 %v456_v8, %v460_v9  ;;  %v453_v17 = vmax.f32 %v437_v10, 0.0  ;;  %808 = vmatpush.msrb.mxu3 %v778_v42  ;;  %v773_v40 = vld [vmem:[%s2285_s3 + $0x270] sm:$0xff]  ;;  %v771_v46 = vld [vmem:[%s2285_s3 + $0x260] sm:$0xff]  ;;  %v754_v52 = vld [vmem:[%s2285_s3 + $0x1d8] sm:$0xff] }
 0x219   :  { %v457_v18 = vmax.f32 %v441_v12, 0.0  ;;  %v461_v19 = vmax.f32 %v445_v13, 0.0  ;;  %780 = vmatpush.msrb.mxu2 %v761_v20  ;;  %v770_v61 = vld [vmem:[%s2285_s3 + $0x258] sm:$0xff]  ;;  %v494_v53 = vld [vmem:[%s2285_s3 + $0x70] sm:$0xff]  ;;  %v752_v57 = vld [vmem:[%s2285_s3 + $0x1c8] sm:$0xff] }
 0x21a   :  { %v472_v21 = vmax.f32 %v464_v11, %v468_v16  ;;  %v465_v22 = vmax.f32 %v449_v14, %v453_v17  ;;  %809 = vmatpush.msrb.mxu3 %v777_v41  ;;  %v753_v56 = vld [vmem:[%s2285_s3 + $0x1d0] sm:$0xff]  ;;  %v768_v58 = vld [vmem:[%s2285_s3 + $0x248] sm:$0xff]  ;;  %v751_v6 = vld [vmem:[%s2285_s3 + $0x1c0] sm:$0xff] }
 0x21b   :  { %v469_v25 = vmax.f32 %v457_v18, %v461_v19  ;;  %781 = vmatpush.msrb.mxu2 %v760_v49  ;;  %v769_v54 = vld [vmem:[%s2285_s3 + $0x250] sm:$0xff]  ;;  %v767_v59 = vld [vmem:[%s2285_s3 + $0x240] sm:$0xff]  ;;  %v750_v24 = vld [vmem:[%s2285_s3 + $0x1b8] sm:$0xff] }
 0x21c   :  { %476 = vst [vmem:[%s2286_s4] sm:$0xff] %v472_v21  ;;  %576 = vmatpush.msrb.mxu0 %v472_v21  ;;  %810 = vmatpush.msrb.mxu3 %v776_v63  ;;  %v766_v60 = vld [vmem:[%s2285_s3 + $0x238] sm:$0xff]  ;;  %v749_v0 = vld [vmem:[%s2285_s3 + $0x1b0] sm:$0xff]  ;;  %v748_v2 = vld [vmem:[%s2285_s3 + $0x1a8] sm:$0xff] }
 0x21d   :  { %v473_v26 = vmax.f32 %v465_v22, %v469_v25  ;;  %1208 = vmatmul.msk.f32.vlgmr.msrb.gmra.mxu0 %vm500_vm6, %v480_v23  ;;  %782 = vmatpush.msrb.mxu2 %v759_v15  ;;  %v495_v62 = vld [vmem:[%s2285_s3 + $0x78] sm:$0xff]  ;;  %v765_v1 = vld [vmem:[%s2285_s3 + $0x230] sm:$0xff]  ;;  %v764_v3 = vld [vmem:[%s2285_s3 + $0x228] sm:$0xff] }
 0x21e   :  { %811 = vmatpush.msrb.mxu3 %v775_v43  ;;  %v747_v7 = vld [vmem:[%s2285_s3 + $0x1a0] sm:$0xff]  ;;  %v730_v9 = vld [vmem:[%s2285_s3 + $0x118] sm:$0xff]  ;;  %v729_v12 = vld [vmem:[%s2285_s3 + $0x110] sm:$0xff] }
 0x21f   :  { %477 = vst [vmem:[%s2286_s4 + $0x8] sm:$0xff] %v473_v26  ;;  %653 = vmatpush.msrb.mxu1 %v473_v26  ;;  %783 = vmatpush.msrb.mxu2 %v758_v47  ;;  %v763_v8 = vld [vmem:[%s2285_s3 + $0x220] sm:$0xff]  ;;  %v746_v10 = vld [vmem:[%s2285_s3 + $0x198] sm:$0xff]  ;;  %v745_v13 = vld [vmem:[%s2285_s3 + $0x190] sm:$0xff] }
 0x220   :  { %1228 = vmatmul.msk.f32.vlgmr.msrb.gmra.mxu1 %vm500_vm6, %v480_v23  ;;  %812 = vmatpush.msrb.mxu3 %v774_v44  ;;  %v496_v11 = vld [vmem:[%s2285_s3 + $0x80] sm:$0xff]  ;;  %v728_v14 = vld [vmem:[%s2285_s3 + $0x108] sm:$0xff]  ;;  %v726_v22 = vld [vmem:[%s2285_s3 + $0xf8] sm:$0xff] }
 0x221   :  { %784 = vmatpush.msrb.mxu2 %v757_v45  ;;  %v744_v16 = vld [vmem:[%s2285_s3 + $0x188] sm:$0xff]  ;;  %v727_v19 = vld [vmem:[%s2285_s3 + $0x100] sm:$0xff]  ;;  %v742_v23 = vld [vmem:[%s2285_s3 + $0x178] sm:$0xff] }
 0x222   :  { %813 = vmatpush.msrb.mxu3 %v773_v40  ;;  %v743_v21 = vld [vmem:[%s2285_s3 + $0x180] sm:$0xff]  ;;  %v497_v25 = vld [vmem:[%s2285_s3 + $0x88] sm:$0xff]  ;;  %v725_v26 = vld [vmem:[%s2285_s3 + $0xf0] sm:$0xff] }
 0x223   :  { %785 = vmatpush.msrb.mxu2 %v756_v48  ;;  %v737_v37 = vld [vmem:[%s2285_s3 + $0x150] sm:$0xff]  ;;  %v720_v42 = vld [vmem:[%s2285_s3 + $0xc8] sm:$0xff]  ;;  %v719_v49 = vld [vmem:[%s2285_s3 + $0xc0] sm:$0xff] }
 0x224   :  { %814 = vmatpush.msrb.mxu3 %v772_v50  ;;  %v735_v63 = vld [vmem:[%s2285_s3 + $0x140] sm:$0xff]  ;;  %v718_v15 = vld [vmem:[%s2285_s3 + $0xb8] sm:$0xff]  ;;  %v717_v44 = vld [vmem:[%s2285_s3 + $0xb0] sm:$0xff] }
 0x225   :  { %1209 = vmatmul.msk.f32.gmra.mxu0 %vm500_vm6, %v481_v27  ;;  %786 = vmatpush.msrb.mxu2 %v755_v51  ;;  %v734_v43 = vld [vmem:[%s2285_s3 + $0x138] sm:$0xff]  ;;  %v716_v45 = vld [vmem:[%s2285_s3 + $0xa8] sm:$0xff]  ;;  %v715_v50 = vld [vmem:[%s2285_s3 + $0xa0] sm:$0xff] }
 0x226   :  { %815 = vmatpush.msrb.mxu3 %v771_v46  ;;  %v499_v47 = vld [vmem:[%s2285_s3 + $0x98] sm:$0xff]  ;;  %v732_v40 = vld [vmem:[%s2285_s3 + $0x128] sm:$0xff]  ;;  %v731_v51 = vld [vmem:[%s2285_s3 + $0x120] sm:$0xff] }
 0x227   :  { %787 = vmatpush.msrb.mxu2 %v754_v52  ;;  %v910_v52 = vld [vmem:[%s2285_s3 + $0x318] sm:$0xff] }
 0x228   :  { %1229 = vmatmul.msk.f32.gmra.mxu1 %vm500_vm6, %v481_v27  ;;  %816 = vmatpush.msrb.mxu3 %v770_v61  ;;  %v741_v27 = vld [vmem:[%s2285_s3 + $0x170] sm:$0xff]  ;;  %v926_v61 = vld [vmem:[%s2285_s3 + $0x398] sm:$0xff] }
 0x229   :  { %788 = vmatpush.msrb.mxu2 %v753_v56  ;;  %v925_v56 = vld [vmem:[%s2285_s3 + $0x390] sm:$0xff] }
 0x22a   :  { %817 = vmatpush.msrb.mxu3 %v769_v54  ;;  %v908_v54 = vld [vmem:[%s2285_s3 + $0x308] sm:$0xff] }
 0x22b   :  { %789 = vmatpush.msrb.mxu2 %v752_v57  ;;  %v924_v57 = vld [vmem:[%s2285_s3 + $0x388] sm:$0xff] }
 0x22c   :  { %818 = vmatpush.msrb.mxu3 %v768_v58 }
 0x22d   :  { %1210 = vmatmul.msk.f32.gmra.mxu0 %vm500_vm6, %v482_v28  ;;  %790 = vmatpush.msrb.mxu2 %v751_v6  ;;  %v907_v6 = vld [vmem:[%s2285_s3 + $0x300] sm:$0xff] }
 0x22e   :  { %819 = vmatpush.msrb.mxu3 %v767_v59  ;;  %v923_v59 = vld [vmem:[%s2285_s3 + $0x380] sm:$0xff] }
 0x22f   :  { %791 = vmatpush.msrb.mxu2 %v750_v24 }
 0x230   :  { %1230 = vmatmul.msk.f32.gmra.mxu1 %vm500_vm6, %v482_v28  ;;  %820 = vmatpush.msrb.mxu3 %v766_v60  ;;  %v724_v28 = vld [vmem:[%s2285_s3 + $0xe8] sm:$0xff]  ;;  %v906_v60 = vld [vmem:[%s2285_s3 + $0x2f8] sm:$0xff] }
 0x231   :  { %792 = vmatpush.msrb.mxu2 %v749_v0  ;;  %v905_v0 = vld [vmem:[%s2285_s3 + $0x2f0] sm:$0xff] }
 0x232   :  { %821 = vmatpush.msrb.mxu3 %v765_v1  ;;  %v921_v1 = vld [vmem:[%s2285_s3 + $0x370] sm:$0xff] }
 0x233   :  { %793 = vmatpush.msrb.mxu2 %v748_v2  ;;  %v904_v2 = vld [vmem:[%s2285_s3 + $0x2e8] sm:$0xff] }
 0x234   :  { %822 = vmatpush.msrb.mxu3 %v764_v3 }
 0x235   :  { %1211 = vmatmul.msk.f32.gmra.mxu0 %vm500_vm6, %v483_v29  ;;  %794 = vmatpush.msrb.mxu2 %v747_v7  ;;  %v920_v7 = vld [vmem:[%s2285_s3 + $0x368] sm:$0xff] }
 0x236   :  { %823 = vmatpush.msrb.mxu3 %v763_v8  ;;  %v903_v8 = vld [vmem:[%s2285_s3 + $0x2e0] sm:$0xff] }
 0x237   :  { %837 = vmatpush.msra.mxu2 %v730_v9  ;;  %v919_v9 = vld [vmem:[%s2285_s3 + $0x360] sm:$0xff] }
 0x238   :  { %1231 = vmatmul.msk.f32.gmra.mxu1 %vm500_vm6, %v483_v29  ;;  %866 = vmatpush.msra.mxu3 %v746_v10  ;;  %v740_v29 = vld [vmem:[%s2285_s3 + $0x168] sm:$0xff] }
 0x239   :  { %838 = vmatpush.msra.mxu2 %v729_v12  ;;  %v918_v12 = vld [vmem:[%s2285_s3 + $0x358] sm:$0xff] }
 0x23a   :  { %867 = vmatpush.msra.mxu3 %v745_v13  ;;  %v901_v13 = vld [vmem:[%s2285_s3 + $0x2d0] sm:$0xff] }
 0x23b   :  { %839 = vmatpush.msra.mxu2 %v728_v14  ;;  %v917_v14 = vld [vmem:[%s2285_s3 + $0x350] sm:$0xff] }
 0x23c   :  { %868 = vmatpush.msra.mxu3 %v744_v16  ;;  %v900_v16 = vld [vmem:[%s2285_s3 + $0x2c8] sm:$0xff] }
 0x23d   :  { %1212 = vmatmul.msk.f32.gmra.mxu0 %vm500_vm6, %v484_v30  ;;  %840 = vmatpush.msra.mxu2 %v727_v19 }
 0x23e   :  { %869 = vmatpush.msra.mxu3 %v743_v21  ;;  %v916_v21 = vld [vmem:[%s2285_s3 + $0x348] sm:$0xff] }
 0x23f   :  { %841 = vmatpush.msra.mxu2 %v726_v22  ;;  %v899_v22 = vld [vmem:[%s2285_s3 + $0x2c0] sm:$0xff] }
 0x240   :  { %1232 = vmatmul.msk.f32.gmra.mxu1 %vm500_vm6, %v484_v30  ;;  %870 = vmatpush.msra.mxu3 %v742_v23  ;;  %v915_v23 = vld [vmem:[%s2285_s3 + $0x340] sm:$0xff] }
 0x241   :  { %842 = vmatpush.msra.mxu2 %v725_v26  ;;  %v898_v26 = vld [vmem:[%s2285_s3 + $0x2b8] sm:$0xff] }
 0x242   :  { %871 = vmatpush.msra.mxu3 %v741_v27  ;;  %v914_v27 = vld [vmem:[%s2285_s3 + $0x338] sm:$0xff] }
 0x243   :  { %843 = vmatpush.msra.mxu2 %v724_v28  ;;  %v897_v28 = vld [vmem:[%s2285_s3 + $0x2b0] sm:$0xff] }
 0x244   :  { %872 = vmatpush.msra.mxu3 %v740_v29  ;;  %v913_v29 = vld [vmem:[%s2285_s3 + $0x330] sm:$0xff] }
 0x245   :  { %1213 = vmatmul.msk.f32.gmra.mxu0 %vm500_vm6, %v485_v31 }
 0x248   :  { %1233 = vmatmul.msk.f32.gmra.mxu1 %vm500_vm6, %v485_v31 }
 0x24d   :  { %1214 = vmatmul.msk.f32.gmra.mxu0 %vm500_vm6, %v486_v32 }
 0x250   :  { %1234 = vmatmul.msk.f32.gmra.mxu1 %vm500_vm6, %v486_v32  ;;  %v723_v32 = vld [vmem:[%s2285_s3 + $0xe0] sm:$0xff] }
 0x251   :  { %844 = vmatpush.msra.mxu2 %v723_v32  ;;  %v896_v32 = vld [vmem:[%s2285_s3 + $0x2a8] sm:$0xff] }
 0x255   :  { %1215 = vmatmul.msk.f32.gmra.mxu0 %vm500_vm6, %v487_v33 }
 0x258   :  { %1235 = vmatmul.msk.f32.gmra.mxu1 %vm500_vm6, %v487_v33  ;;  %v739_v33 = vld [vmem:[%s2285_s3 + $0x160] sm:$0xff] }
 0x259   :  { %873 = vmatpush.msra.mxu3 %v739_v33  ;;  %v912_v33 = vld [vmem:[%s2285_s3 + $0x328] sm:$0xff] }
 0x25d   :  { %1216 = vmatmul.msk.f32.gmra.mxu0 %vm500_vm6, %v488_v34 }
 0x260   :  { %1236 = vmatmul.msk.f32.gmra.mxu1 %vm500_vm6, %v488_v34  ;;  %v722_v34 = vld [vmem:[%s2285_s3 + $0xd8] sm:$0xff] }
 0x261   :  { %845 = vmatpush.msra.mxu2 %v722_v34  ;;  %v895_v34 = vld [vmem:[%s2285_s3 + $0x2a0] sm:$0xff] }
 0x265   :  { %1217 = vmatmul.msk.f32.gmra.mxu0 %vm500_vm6, %v489_v35 }
 0x268   :  { %1237 = vmatmul.msk.f32.gmra.mxu1 %vm500_vm6, %v489_v35  ;;  %v738_v35 = vld [vmem:[%s2285_s3 + $0x158] sm:$0xff] }
 0x269   :  { %874 = vmatpush.msra.mxu3 %v738_v35  ;;  %v911_v35 = vld [vmem:[%s2285_s3 + $0x320] sm:$0xff] }
 0x26b   :  { %875 = vmatpush.msra.mxu3 %v737_v37  ;;  %v1019_v37 = vld [vmem:[%s2285_s3 + $0x490] sm:$0xff] }
 0x26d   :  { %1218 = vmatmul.msk.f32.gmra.mxu0 %vm500_vm6, %v490_v36 }
 0x270   :  { %1238 = vmatmul.msk.f32.gmra.mxu1 %vm500_vm6, %v490_v36  ;;  %v498_v36 = vld [vmem:[%s2285_s3 + $0x90] sm:$0xff] }
 0x275   :  { %1219 = vmatmul.msk.f32.gmra.mxu0 %vm500_vm6, %v491_v38 }
 0x278   :  { %1239 = vmatmul.msk.f32.gmra.mxu1 %vm500_vm6, %v491_v38  ;;  %v721_v38 = vld [vmem:[%s2285_s3 + $0xd0] sm:$0xff] }
 0x279   :  { %846 = vmatpush.msra.mxu2 %v721_v38  ;;  %v1003_v38 = vld [vmem:[%s2285_s3 + $0x410] sm:$0xff] }
 0x27b   :  { %847 = vmatpush.msra.mxu2 %v720_v42  ;;  %v1018_v42 = vld [vmem:[%s2285_s3 + $0x488] sm:$0xff] }
 0x27d   :  { %1220 = vmatmul.msk.f32.gmra.mxu0 %vm500_vm6, %v492_v55  ;;  %848 = vmatpush.msra.mxu2 %v719_v49  ;;  %v1001_v49 = vld [vmem:[%s2285_s3 + $0x400] sm:$0xff] }
 0x27f   :  { %849 = vmatpush.msra.mxu2 %v718_v15 }
 0x280   :  { %1240 = vmatmul.msk.f32.gmra.mxu1 %vm500_vm6, %v492_v55  ;;  %v736_v55 = vld [vmem:[%s2285_s3 + $0x148] sm:$0xff] }
 0x281   :  { %876 = vmatpush.msra.mxu3 %v736_v55  ;;  %850 = vmatpush.msra.mxu2 %v717_v44  ;;  %v1015_v44 = vld [vmem:[%s2285_s3 + $0x470] sm:$0xff] }
 0x283   :  { %877 = vmatpush.msra.mxu3 %v735_v63  ;;  %851 = vmatpush.msra.mxu2 %v716_v45  ;;  %v1017_v63 = vld [vmem:[%s2285_s3 + $0x480] sm:$0xff] }
 0x284   :  { %v997_v45 = vld [vmem:[%s2285_s3 + $0x3e0] sm:$0xff] }
 0x285   :  { %1221 = vmatmul.msk.f32.gmra.mxu0 %vm500_vm6, %v493_v39  ;;  %878 = vmatpush.msra.mxu3 %v734_v43  ;;  %v1000_v43 = vld [vmem:[%s2285_s3 + $0x3f8] sm:$0xff] }
 0x286   :  { %852 = vmatpush.msra.mxu2 %v715_v50  ;;  %v996_v50 = vld [vmem:[%s2285_s3 + $0x3d8] sm:$0xff] }
 0x288   :  { %1241 = vmatmul.msk.f32.gmra.mxu1 %vm500_vm6, %v493_v39  ;;  %v733_v39 = vld [vmem:[%s2285_s3 + $0x130] sm:$0xff] }
 0x289   :  { %879 = vmatpush.msra.mxu3 %v733_v39  ;;  %v1014_v39 = vld [vmem:[%s2285_s3 + $0x468] sm:$0xff] }
 0x28b   :  { %880 = vmatpush.msra.mxu3 %v732_v40 }
 0x28d   :  { %1222 = vmatmul.msk.f32.gmra.mxu0 %vm500_vm6, %v494_v53  ;;  %881 = vmatpush.msra.mxu3 %v731_v51 }
 0x290   :  { %1242 = vmatmul.msk.f32.gmra.mxu1 %vm500_vm6, %v494_v53  ;;  %v909_v53 = vld [vmem:[%s2285_s3 + $0x310] sm:$0xff] }
 0x295   :  { %1223 = vmatmul.msk.f32.gmra.mxu0 %vm500_vm6, %v495_v62 }
 0x298   :  { %1243 = vmatmul.msk.f32.gmra.mxu1 %vm500_vm6, %v495_v62  ;;  %v922_v62 = vld [vmem:[%s2285_s3 + $0x378] sm:$0xff] }
 0x29a   :  { %v1838_v4 = vpop.f32.mrf.mxu0 }
 0x29d   :  { %v1840_v5 = vpop.f32.mrf.mxu1  ;;  %1224 = vmatmul.msk.f32.gmra.mxu0 %vm500_vm6, %v496_v11 }
 0x2a0   :  { %1244 = vmatmul.msk.f32.gmra.mxu1 %vm500_vm6, %v496_v11  ;;  %v902_v11 = vld [vmem:[%s2285_s3 + $0x2d8] sm:$0xff] }
 0x2a2   :  { %v1871_v17 = vpop.f32.mrf.mxu0 }
 0x2a5   :  { %v1873_v18 = vpop.f32.mrf.mxu1  ;;  %1225 = vmatmul.msk.f32.gmra.mxu0 %vm500_vm6, %v497_v25 }
 0x2a8   :  { %1245 = vmatmul.msk.f32.gmra.mxu1 %vm500_vm6, %v497_v25 }
 0x2aa   :  { %v1904_v30 = vpop.f32.mrf.mxu0 }
 0x2ad   :  { %v1906_v31 = vpop.f32.mrf.mxu1  ;;  %1226 = vmatmul.msk.f32.gmra.mxu0 %vm500_vm6, %v498_v36 }
 0x2b0   :  { %1246 = vmatmul.msk.f32.gmra.mxu1 %vm500_vm6, %v498_v36  ;;  %v1004_v36 = vld [vmem:[%s2285_s3 + $0x418] sm:$0xff] }
 0x2b2   :  { %v1937_v20 = vpop.f32.mrf.mxu0 }
 0x2b5   :  { %v1939_v41 = vpop.f32.mrf.mxu1  ;;  %1227 = vmatmul.msk.f32.gmra.mxu0 %vm500_vm6, %v499_v47 }
 0x2b8   :  { %1247 = vmatmul.msk.f32.gmra.mxu1 %vm500_vm6, %v499_v47  ;;  %v999_v47 = vld [vmem:[%s2285_s3 + $0x3f0] sm:$0xff] }
 0x2ba   :  { %v590_v48 = vpop.f32.mrf.mxu0 }
 0x2bb   :  { %795 = vmatmul.f32.vlgmr.msrb.gmra.mxu2 %v590_v48  ;;  %v1013_v48 = vld [vmem:[%s2285_s3 + $0x460] sm:$0xff] }
 0x2bc   :  { %927 = vmatpush.msrb.mxu2 %v910_v52  ;;  %v994_v52 = vld [vmem:[%s2285_s3 + $0x3c8] sm:$0xff] }
 0x2bd   :  { %v667_v46 = vpop.f32.mrf.mxu1 }
 0x2be   :  { %824 = vmatmul.f32.vlgmr.msrb.gmra.mxu3 %v667_v46  ;;  %928 = vmatpush.msrb.mxu2 %v909_v53  ;;  %v995_v46 = vld [vmem:[%s2285_s3 + $0x3d0] sm:$0xff]  ;;  %v993_v53 = vld [vmem:[%s2285_s3 + $0x3c0] sm:$0xff] }
 0x2bf   :  { %956 = vmatpush.msrb.mxu3 %v926_v61  ;;  %v1010_v61 = vld [vmem:[%s2285_s3 + $0x448] sm:$0xff] }
 0x2c0   :  { %929 = vmatpush.msrb.mxu2 %v908_v54 }
 0x2c1   :  { %957 = vmatpush.msrb.mxu3 %v925_v56  ;;  %v1009_v56 = vld [vmem:[%s2285_s3 + $0x440] sm:$0xff] }
 0x2c2   :  { %v593_v58 = vpop.f32.mrf.mxu0  ;;  %930 = vmatpush.msrb.mxu2 %v907_v6 }
 0x2c3   :  { %798 = vmatmul.f32.gmra.mxu2 %v593_v58  ;;  %958 = vmatpush.msrb.mxu3 %v924_v57  ;;  %v992_v57 = vld [vmem:[%s2285_s3 + $0x3b8] sm:$0xff]  ;;  %v991_v58 = vld [vmem:[%s2285_s3 + $0x3b0] sm:$0xff] }
 0x2c4   :  { %931 = vmatpush.msrb.mxu2 %v906_v60  ;;  %v989_v60 = vld [vmem:[%s2285_s3 + $0x3a0] sm:$0xff] }
 0x2c5   :  { %v670_v24 = vpop.f32.mrf.mxu1  ;;  %959 = vmatpush.msrb.mxu3 %v923_v59  ;;  %v990_v59 = vld [vmem:[%s2285_s3 + $0x3a8] sm:$0xff] }
 0x2c6   :  { %827 = vmatmul.f32.gmra.mxu3 %v670_v24  ;;  %932 = vmatpush.msrb.mxu2 %v905_v0  ;;  %v1006_v24 = vld [vmem:[%s2285_s3 + $0x428] sm:$0xff]  ;;  %v1098_v0 = vld [vmem:[%s2285_s3 + $0x518] sm:$0xff] }
 0x2c7   :  { %960 = vmatpush.msrb.mxu3 %v922_v62  ;;  %v1005_v62 = vld [vmem:[%s2285_s3 + $0x420] sm:$0xff] }
 0x2c8   :  { %933 = vmatpush.msrb.mxu2 %v904_v2  ;;  %v1097_v2 = vld [vmem:[%s2285_s3 + $0x510] sm:$0xff] }
 0x2c9   :  { %961 = vmatpush.msrb.mxu3 %v921_v1  ;;  %v1114_v1 = vld [vmem:[%s2285_s3 + $0x598] sm:$0xff] }
 0x2ca   :  { %v596_v3 = vpop.f32.mrf.mxu0  ;;  %934 = vmatpush.msrb.mxu2 %v903_v8  ;;  %v1096_v8 = vld [vmem:[%s2285_s3 + $0x508] sm:$0xff] }
 0x2cb   :  { %801 = vmatmul.f32.gmra.mxu2 %v596_v3  ;;  %962 = vmatpush.msrb.mxu3 %v920_v7  ;;  %v1113_v3 = vld [vmem:[%s2285_s3 + $0x590] sm:$0xff] }
 0x2cc   :  { %935 = vmatpush.msrb.mxu2 %v902_v11  ;;  %v1095_v11 = vld [vmem:[%s2285_s3 + $0x500] sm:$0xff] }
 0x2cd   :  { %v673_v10 = vpop.f32.mrf.mxu1  ;;  %963 = vmatpush.msrb.mxu3 %v919_v9  ;;  %v1112_v9 = vld [vmem:[%s2285_s3 + $0x588] sm:$0xff] }
 0x2ce   :  { %830 = vmatmul.f32.gmra.mxu3 %v673_v10  ;;  %936 = vmatpush.msrb.mxu2 %v901_v13  ;;  %v1094_v13 = vld [vmem:[%s2285_s3 + $0x4f8] sm:$0xff] }
 0x2cf   :  { %964 = vmatpush.msrb.mxu3 %v918_v12  ;;  %v1111_v12 = vld [vmem:[%s2285_s3 + $0x580] sm:$0xff] }
 0x2d0   :  { %937 = vmatpush.msrb.mxu2 %v900_v16  ;;  %v1093_v16 = vld [vmem:[%s2285_s3 + $0x4f0] sm:$0xff] }
 0x2d1   :  { %965 = vmatpush.msrb.mxu3 %v917_v14  ;;  %v1110_v14 = vld [vmem:[%s2285_s3 + $0x578] sm:$0xff] }
 0x2d2   :  { %v599_v19 = vpop.f32.mrf.mxu0  ;;  %938 = vmatpush.msrb.mxu2 %v899_v22 }
 0x2d3   :  { %804 = vmatmul.f32.gmra.mxu2 %v599_v19  ;;  %966 = vmatpush.msrb.mxu3 %v916_v21  ;;  %v1109_v19 = vld [vmem:[%s2285_s3 + $0x570] sm:$0xff]  ;;  %v1092_v21 = vld [vmem:[%s2285_s3 + $0x4e8] sm:$0xff] }
 0x2d4   :  { %939 = vmatpush.msrb.mxu2 %v898_v26  ;;  %v1107_v26 = vld [vmem:[%s2285_s3 + $0x560] sm:$0xff] }
 0x2d5   :  { %v676_v25 = vpop.f32.mrf.mxu1  ;;  %967 = vmatpush.msrb.mxu3 %v915_v23  ;;  %v1108_v23 = vld [vmem:[%s2285_s3 + $0x568] sm:$0xff] }
 0x2d6   :  { %833 = vmatmul.f32.gmra.mxu3 %v676_v25  ;;  %940 = vmatpush.msrb.mxu2 %v897_v28  ;;  %v1091_v25 = vld [vmem:[%s2285_s3 + $0x4e0] sm:$0xff]  ;;  %v1090_v28 = vld [vmem:[%s2285_s3 + $0x4d8] sm:$0xff] }
 0x2d7   :  { %968 = vmatpush.msrb.mxu3 %v914_v27 }
 0x2d8   :  { %941 = vmatpush.msrb.mxu2 %v896_v32  ;;  %v1089_v32 = vld [vmem:[%s2285_s3 + $0x4d0] sm:$0xff] }
 0x2d9   :  { %969 = vmatpush.msrb.mxu3 %v913_v29  ;;  %v1106_v29 = vld [vmem:[%s2285_s3 + $0x558] sm:$0xff] }
 0x2da   :  { %942 = vmatpush.msrb.mxu2 %v895_v34  ;;  %v602_v55 = vpop.f32.mrf.mxu0  ;;  %v1088_v34 = vld [vmem:[%s2285_s3 + $0x4c8] sm:$0xff] }
 0x2db   :  { %853 = vmatmul.f32.vlgmr.msra.gmra.mxu2 %v1838_v4  ;;  %970 = vmatpush.msrb.mxu3 %v912_v33  ;;  %v1020_v4 = vld [vmem:[%s2285_s3 + $0x498] sm:$0xff]  ;;  %v1105_v33 = vld [vmem:[%s2285_s3 + $0x550] sm:$0xff] }
 0x2dc   :  { %1021 = vmatpush.msra.mxu2 %v1004_v36  ;;  %v1087_v36 = vld [vmem:[%s2285_s3 + $0x4c0] sm:$0xff] }
 0x2dd   :  { %971 = vmatpush.msrb.mxu3 %v911_v35  ;;  %v679_v15 = vpop.f32.mrf.mxu1  ;;  %v1104_v35 = vld [vmem:[%s2285_s3 + $0x548] sm:$0xff] }
 0x2de   :  { %882 = vmatmul.f32.vlgmr.msra.gmra.mxu3 %v1840_v5  ;;  %1022 = vmatpush.msra.mxu2 %v1003_v38  ;;  %v1002_v5 = vld [vmem:[%s2285_s3 + $0x408] sm:$0xff]  ;;  %v1103_v38 = vld [vmem:[%s2285_s3 + $0x540] sm:$0xff] }
 0x2df   :  { %1050 = vmatpush.msra.mxu3 %v1020_v4 }
 0x2e0   :  { %1023 = vmatpush.msra.mxu2 %v1002_v5  ;;  %v1102_v5 = vld [vmem:[%s2285_s3 + $0x538] sm:$0xff] }
 0x2e1   :  { %1051 = vmatpush.msra.mxu3 %v1019_v37  ;;  %v1086_v37 = vld [vmem:[%s2285_s3 + $0x4b8] sm:$0xff] }
 0x2e2   :  { %1024 = vmatpush.msra.mxu2 %v1001_v49  ;;  %v605_v40 = vpop.f32.mrf.mxu0  ;;  %v1101_v49 = vld [vmem:[%s2285_s3 + $0x530] sm:$0xff] }
 0x2e3   :  { %856 = vmatmul.f32.gmra.mxu2 %v1871_v17  ;;  %1052 = vmatpush.msra.mxu3 %v1018_v42  ;;  %v1016_v17 = vld [vmem:[%s2285_s3 + $0x478] sm:$0xff] }
 0x2e4   :  { %1025 = vmatpush.msra.mxu2 %v1000_v43  ;;  %v1083_v43 = vld [vmem:[%s2285_s3 + $0x4a0] sm:$0xff] }
 0x2e5   :  { %1053 = vmatpush.msra.mxu3 %v1017_v63  ;;  %v682_v51 = vpop.f32.mrf.mxu1  ;;  %v1084_v63 = vld [vmem:[%s2285_s3 + $0x4a8] sm:$0xff] }
 0x2e6   :  { %885 = vmatmul.f32.gmra.mxu3 %v1873_v18  ;;  %v998_v18 = vld [vmem:[%s2285_s3 + $0x3e8] sm:$0xff]  ;;  %1026 = vmatpush.msra.mxu2 %v999_v47 }
 0x2e7   :  { %1054 = vmatpush.msra.mxu3 %v1016_v17  ;;  %v1099_v17 = vld [vmem:[%s2285_s3 + $0x520] sm:$0xff] }
 0x2e8   :  { %1027 = vmatpush.msra.mxu2 %v998_v18 }
 0x2e9   :  { %1055 = vmatpush.msra.mxu3 %v1015_v44 }
 0x2ea   :  { %1028 = vmatpush.msra.mxu2 %v997_v45  ;;  %v608_v54 = vpop.f32.mrf.mxu0 }
 0x2eb   :  { %859 = vmatmul.f32.gmra.mxu2 %v1904_v30  ;;  %1056 = vmatpush.msra.mxu3 %v1014_v39  ;;  %v1012_v30 = vld [vmem:[%s2285_s3 + $0x458] sm:$0xff] }
 0x2ec   :  { %1029 = vmatpush.msra.mxu2 %v996_v50 }
 0x2ed   :  { %1057 = vmatpush.msra.mxu3 %v1013_v48  ;;  %v685_v6 = vpop.f32.mrf.mxu1 }
 0x2ee   :  { %888 = vmatmul.f32.gmra.mxu3 %v1906_v31  ;;  %v1011_v31 = vld [vmem:[%s2285_s3 + $0x450] sm:$0xff]  ;;  %1030 = vmatpush.msra.mxu2 %v995_v46 }
 0x2ef   :  { %1058 = vmatpush.msra.mxu3 %v1012_v30 }
 0x2f0   :  { %1031 = vmatpush.msra.mxu2 %v994_v52 }
 0x2f1   :  { %1059 = vmatpush.msra.mxu3 %v1011_v31 }
 0x2f2   :  { %1032 = vmatpush.msra.mxu2 %v993_v53  ;;  %v611_v7 = vpop.f32.mrf.mxu0 }
 0x2f3   :  { %862 = vmatmul.f32.gmra.mxu2 %v1937_v20  ;;  %1060 = vmatpush.msra.mxu3 %v1010_v61  ;;  %v1008_v20 = vld [vmem:[%s2285_s3 + $0x438] sm:$0xff] }
 0x2f4   :  { %1033 = vmatpush.msra.mxu2 %v992_v57 }
 0x2f5   :  { %1061 = vmatpush.msra.mxu3 %v1009_v56  ;;  %v688_v10 = vpop.f32.mrf.mxu1 }
 0x2f6   :  { %891 = vmatmul.f32.gmra.mxu3 %v1939_v41  ;;  %v1007_v41 = vld [vmem:[%s2285_s3 + $0x430] sm:$0xff]  ;;  %1034 = vmatpush.msra.mxu2 %v991_v58 }
 0x2f7   :  { %1062 = vmatpush.msra.mxu3 %v1008_v20 }
 0x2f8   :  { %1035 = vmatpush.msra.mxu2 %v990_v59 }
 0x2f9   :  { %1063 = vmatpush.msra.mxu3 %v1007_v41 }
 0x2fa   :  { %1036 = vmatpush.msra.mxu2 %v989_v60  ;;  %v614_v22 = vpop.f32.mrf.mxu0 }
 0x2fb   :  { %943 = vmatmul.f32.vlgmr.msrb.gmra.mxu2 %v602_v55  ;;  %1064 = vmatpush.msra.mxu3 %v1006_v24  ;;  %v1085_v55 = vld [vmem:[%s2285_s3 + $0x4b0] sm:$0xff] }
 0x2fc   :  { %1115 = vmatpush.msrb.mxu2 %v1098_v0 }
 0x2fd   :  { %1065 = vmatpush.msra.mxu3 %v1005_v62  ;;  %v691_v27 = vpop.f32.mrf.mxu1 }
 0x2fe   :  { %972 = vmatmul.f32.vlgmr.msrb.gmra.mxu3 %v679_v15  ;;  %1116 = vmatpush.msrb.mxu2 %v1097_v2  ;;  %v1100_v15 = vld [vmem:[%s2285_s3 + $0x528] sm:$0xff] }
 0x2ff   :  { %1144 = vmatpush.msrb.mxu3 %v1114_v1 }
 0x300   :  { %1117 = vmatpush.msrb.mxu2 %v1096_v8 }
 0x301   :  { %1145 = vmatpush.msrb.mxu3 %v1113_v3 }
 0x302   :  { %1118 = vmatpush.msrb.mxu2 %v1095_v11  ;;  %v617_v4 = vpop.f32.mrf.mxu0 }
 0x303   :  { %946 = vmatmul.f32.gmra.mxu2 %v605_v40  ;;  %1146 = vmatpush.msrb.mxu3 %v1112_v9 }
 0x304   :  { %1119 = vmatpush.msrb.mxu2 %v1094_v13 }
 0x305   :  { %1147 = vmatpush.msrb.mxu3 %v1111_v12  ;;  %v694_v42 = vpop.f32.mrf.mxu1 }
 0x306   :  { %975 = vmatmul.f32.gmra.mxu3 %v682_v51  ;;  %1120 = vmatpush.msrb.mxu2 %v1093_v16 }
 0x307   :  { %1148 = vmatpush.msrb.mxu3 %v1110_v14 }
 0x308   :  { %1121 = vmatpush.msrb.mxu2 %v1092_v21 }
 0x309   :  { %1149 = vmatpush.msrb.mxu3 %v1109_v19 }
 0x30a   :  { %1122 = vmatpush.msrb.mxu2 %v1091_v25  ;;  %v620_v47 = vpop.f32.mrf.mxu0 }
 0x30b   :  { %949 = vmatmul.f32.gmra.mxu2 %v608_v54  ;;  %1150 = vmatpush.msrb.mxu3 %v1108_v23 }
 0x30c   :  { %1123 = vmatpush.msrb.mxu2 %v1090_v28 }
 0x30d   :  { %1151 = vmatpush.msrb.mxu3 %v1107_v26  ;;  %v697_v44 = vpop.f32.mrf.mxu1 }
 0x30e   :  { %978 = vmatmul.f32.gmra.mxu3 %v685_v6  ;;  %1124 = vmatpush.msrb.mxu2 %v1089_v32 }
 0x30f   :  { %1152 = vmatpush.msrb.mxu3 %v1106_v29 }
 0x310   :  { %1125 = vmatpush.msrb.mxu2 %v1088_v34 }
 0x311   :  { %1153 = vmatpush.msrb.mxu3 %v1105_v33 }
 0x312   :  { %1126 = vmatpush.msrb.mxu2 %v1087_v36  ;;  %v623_v18 = vpop.f32.mrf.mxu0 }
 0x313   :  { %952 = vmatmul.f32.gmra.mxu2 %v611_v7  ;;  %1154 = vmatpush.msrb.mxu3 %v1104_v35 }
 0x314   :  { %1127 = vmatpush.msrb.mxu2 %v1086_v37 }
 0x315   :  { %1155 = vmatpush.msrb.mxu3 %v1103_v38  ;;  %v700_v39 = vpop.f32.mrf.mxu1 }
 0x316   :  { %981 = vmatmul.f32.gmra.mxu3 %v688_v10  ;;  %1128 = vmatpush.msrb.mxu2 %v1085_v55 }
 0x317   :  { %1156 = vmatpush.msrb.mxu3 %v1102_v5 }
 0x318   :  { %1129 = vmatpush.msrb.mxu2 %v1084_v63 }
 0x319   :  { %1157 = vmatpush.msrb.mxu3 %v1101_v49 }
 0x31a   :  { %1130 = vmatpush.msrb.mxu2 %v1083_v43  ;;  %v626_v45 = vpop.f32.mrf.mxu0 }
 0x31b   :  { %1037 = vmatmul.f32.vlgmr.msra.gmra.mxu2 %v614_v22  ;;  %1158 = vmatpush.msrb.mxu3 %v1100_v15 }
 0x31d   :  { %1159 = vmatpush.msrb.mxu3 %v1099_v17  ;;  %v703_v40 = vpop.f32.mrf.mxu1  ;;  %v1255_v17 = vld [vmem:[%s2284_s2] sm:$0x77]  ;;  %s1284_s2 = smov [#allocation2]  }
 0x31e   :  { %1066 = vmatmul.f32.vlgmr.msra.gmra.mxu3 %v691_v27  ;;  %s1192_s9 = sshll.u32 %s1284_s2, 4  ;;  %s1193_s9 = int_to_ptr.vmem [resolvable:$true] %s1192_s9 }
 0x322   :  { %v629_v48 = vpop.f32.mrf.mxu0 }
 0x323   :  { %1040 = vmatmul.f32.gmra.mxu2 %v617_v4 }
 0x325   :  { %v706_v30 = vpop.f32.mrf.mxu1 }
 0x326   :  { %1069 = vmatmul.f32.gmra.mxu3 %v694_v42 }
 0x32a   :  { %v632_v52 = vpop.f32.mrf.mxu0 }
 0x32b   :  { %1043 = vmatmul.f32.gmra.mxu2 %v620_v47  ;;  %v1177_v47 = vperm.slane %v1255_v17, 2 }
 0x32d   :  { %v709_v53 = vpop.f32.mrf.mxu1 }
 0x32e   :  { %1072 = vmatmul.f32.gmra.mxu3 %v697_v44 }
 0x332   :  { %v635_v57 = vpop.f32.mrf.mxu0 }
 0x333   :  { %1046 = vmatmul.f32.gmra.mxu2 %v623_v18 }
 0x335   :  { %v712_v41 = vpop.f32.mrf.mxu1 }
 0x336   :  { %1075 = vmatmul.f32.gmra.mxu3 %v700_v39 }
 0x33b   :  { %1131 = vmatmul.f32.vlgmr.msrb.gmra.mxu2 %v626_v45 }
 0x33e   :  { %1160 = vmatmul.f32.vlgmr.msrb.gmra.mxu3 %v703_v40  ;;  %v796_v50 = vpop.f32.mrf.mxu2 }
 0x341   :  { %v825_v51 = vpop.f32.mrf.mxu3 }
 0x342   :  { %v826_v46 = vadd.f32 %v825_v51, %v796_v50 }
 0x343   :  { %1134 = vmatmul.f32.gmra.mxu2 %v629_v48 }
 0x346   :  { %1163 = vmatmul.f32.gmra.mxu3 %v706_v30  ;;  %v799_v31 = vpop.f32.mrf.mxu2 }
 0x349   :  { %v828_v61 = vpop.f32.mrf.mxu3 }
 0x34a   :  { %v829_v56 = vadd.f32 %v828_v61, %v799_v31 }
 0x34b   :  { %1137 = vmatmul.f32.gmra.mxu2 %v632_v52 }
 0x34e   :  { %1166 = vmatmul.f32.gmra.mxu3 %v709_v53  ;;  %v802_v54 = vpop.f32.mrf.mxu2 }
 0x351   :  { %v831_v20 = vpop.f32.mrf.mxu3 }
 0x352   :  { %v832_v58 = vadd.f32 %v831_v20, %v802_v54 }
 0x353   :  { %1140 = vmatmul.f32.gmra.mxu2 %v635_v57 }
 0x356   :  { %1169 = vmatmul.f32.gmra.mxu3 %v712_v41  ;;  %v805_v6 = vpop.f32.mrf.mxu2 }
 0x359   :  { %v834_v59 = vpop.f32.mrf.mxu3 }
 0x35a   :  { %v835_v24 = vadd.f32 %v834_v59, %v805_v6 }
 0x35e   :  { %v854_v60 = vpop.f32.mrf.mxu2 }
 0x35f   :  { %v855_v62 = vadd.f32 %v854_v60, %v826_v46 }
 0x361   :  { %v883_v0 = vpop.f32.mrf.mxu3 }
 0x362   :  { %v884_v1 = vadd.f32 %v883_v0, %v855_v62 }
 0x366   :  { %v857_v2 = vpop.f32.mrf.mxu2 }
 0x367   :  { %v858_v3 = vadd.f32 %v857_v2, %v829_v56 }
 0x369   :  { %v886_v7 = vpop.f32.mrf.mxu3 }
 0x36a   :  { %v887_v8 = vadd.f32 %v886_v7, %v858_v3 }
 0x36e   :  { %v860_v9 = vpop.f32.mrf.mxu2 }
 0x36f   :  { %v861_v10 = vadd.f32 %v860_v9, %v832_v58 }
 0x371   :  { %v889_v11 = vpop.f32.mrf.mxu3 }
 0x372   :  { %v890_v12 = vadd.f32 %v889_v11, %v861_v10 }
 0x376   :  { %v863_v13 = vpop.f32.mrf.mxu2 }
 0x377   :  { %v864_v14 = vadd.f32 %v863_v13, %v835_v24 }
 0x379   :  { %v892_v16 = vpop.f32.mrf.mxu3 }
 0x37a   :  { %v893_v19 = vadd.f32 %v892_v16, %v864_v14 }
 0x37e   :  { %v944_v21 = vpop.f32.mrf.mxu2 }
 0x381   :  { %v973_v22 = vpop.f32.mrf.mxu3 }
 0x382   :  { %v974_v5 = vadd.f32 %v973_v22, %v944_v21 }
 0x384   :  { %v985_v49 = vadd.f32 %v974_v5, %v884_v1 }
 0x386   :  { %v947_v23 = vpop.f32.mrf.mxu2 }
 0x389   :  { %v976_v25 = vpop.f32.mrf.mxu3 }
 0x38a   :  { %v977_v44 = vadd.f32 %v976_v25, %v947_v23 }
 0x38c   :  { %v986_v48 = vadd.f32 %v977_v44, %v887_v8 }
 0x38e   :  { %v950_v26 = vpop.f32.mrf.mxu2 }
 0x391   :  { %v979_v27 = vpop.f32.mrf.mxu3 }
 0x392   :  { %v980_v46 = vadd.f32 %v979_v27, %v950_v26 }
 0x394   :  { %v987_v56 = vadd.f32 %v980_v46, %v890_v12 }
 0x396   :  { %v953_v28 = vpop.f32.mrf.mxu2 }
 0x399   :  { %v982_v29 = vpop.f32.mrf.mxu3 }
 0x39a   :  { %v983_v58 = vadd.f32 %v982_v29, %v953_v28 }
 0x39c   :  { %v988_v60 = vadd.f32 %v983_v58, %v893_v19 }
 0x39e   :  { %v1038_v32 = vpop.f32.mrf.mxu2 }
 0x3a1   :  { %v1067_v33 = vpop.f32.mrf.mxu3 }
 0x3a2   :  { %v1068_v42 = vadd.f32 %v1067_v33, %v1038_v32 }
 0x3a4   :  { %v1079_v15 = vadd.f32 %v1068_v42, %v985_v49 }
 0x3a6   :  { %v1041_v34 = vpop.f32.mrf.mxu2 }
 0x3a9   :  { %v1070_v35 = vpop.f32.mrf.mxu3 }
 0x3aa   :  { %v1071_v39 = vadd.f32 %v1070_v35, %v1041_v34 }
 0x3ac   :  { %v1080_v30 = vadd.f32 %v1071_v39, %v986_v48 }
 0x3ae   :  { %v1044_v36 = vpop.f32.mrf.mxu2 }
 0x3b1   :  { %v1073_v4 = vpop.f32.mrf.mxu3 }
 0x3b2   :  { %v1074_v52 = vadd.f32 %v1073_v4, %v1044_v36 }
 0x3b4   :  { %v1081_v57 = vadd.f32 %v1074_v52, %v987_v56 }
 0x3b6   :  { %v1047_v38 = vpop.f32.mrf.mxu2 }
 0x3b9   :  { %v1076_v37 = vpop.f32.mrf.mxu3 }
 0x3ba   :  { %v1077_v6 = vadd.f32 %v1076_v37, %v1047_v38 }
 0x3bc   :  { %v1082_v0 = vadd.f32 %v1077_v6, %v988_v60 }
 0x3be   :  { %v1132_v55 = vpop.f32.mrf.mxu2 }
 0x3c1   :  { %v1161_v63 = vpop.f32.mrf.mxu3 }
 0x3c2   :  { %v1162_v43 = vadd.f32 %v1161_v63, %v1132_v55 }
 0x3c4   :  { %v1173_v18 = vadd.f32 %v1162_v43, %v1079_v15 }
 0x3c6   :  { %v1178_v45 = vadd.f32 %v1177_v47, %v1173_v18  ;;  %v1135_v40 = vpop.f32.mrf.mxu2 }
 0x3c8   :  { %1182 = vst.msk [vmem:[#allocation2] sm:$0xff] %vm500_vm6, %v1178_v45 }
 0x3c9   :  { %v1164_v50 = vpop.f32.mrf.mxu3 }
 0x3ca   :  { %v1165_v51 = vadd.f32 %v1164_v50, %v1135_v40 }
 0x3cc   :  { %v1174_v31 = vadd.f32 %v1165_v51, %v1080_v30 }
 0x3ce   :  { %v1179_v61 = vadd.f32 %v1177_v47, %v1174_v31  ;;  %v1138_v53 = vpop.f32.mrf.mxu2 }
 0x3d0   :  { %1183 = vst.msk [vmem:[#allocation2 + $0x8] sm:$0xff] %vm500_vm6, %v1179_v61 }
 0x3d1   :  { %v1167_v54 = vpop.f32.mrf.mxu3 }
 0x3d2   :  { %v1168_v20 = vadd.f32 %v1167_v54, %v1138_v53 }
 0x3d4   :  { %v1175_v41 = vadd.f32 %v1168_v20, %v1081_v57 }
 0x3d6   :  { %v1180_v59 = vadd.f32 %v1177_v47, %v1175_v41  ;;  %v1141_v24 = vpop.f32.mrf.mxu2 }
 0x3d8   :  { %1184 = vst.msk [vmem:[#allocation2 + $0x10] sm:$0xff] %vm500_vm6, %v1180_v59 }
 0x3d9   :  { %v1170_v62 = vpop.f32.mrf.mxu3 }
 0x3da   :  { %v1171_v1 = vadd.f32 %v1170_v62, %v1141_v24 }
 0x3dc   :  { %v1176_v2 = vadd.f32 %v1171_v1, %v1082_v0 }
 0x3de   :  { %v1181_v3 = vadd.f32 %v1177_v47, %v1176_v2 }
 0x3e0   :  { %1185 = vst.msk [vmem:[#allocation2 + $0x18] sm:$0xff] %vm500_vm6, %v1181_v3 }
 0x3e1   :  { %1200 = dma.vmem_to_hbm [thread:$0]  %s1193_s9, 512, %s1195_s12, [#allocation3], %s1285_s13, %s1285_s13, %s1286_s14  }
 0x3e2   :  { %1280 = dma.done.wait [#allocation3], 512  }
 0x3e3   :  { %1281 = vsyncadd [#allocation3], 4294966784 }
 0x3e4   :  { %1207 = vsyncpa [#allocation3], 1 }

</bundles_post_ra>
